<compile_context>
chip_gen: v6e
topology: v6e:2x2x1
jax: 0.10.0
libtpu: 0.0.40
codegen_flags: <defaults>
</compile_context>

<pallas_src>
import jax
import jax.numpy as jnp
from jax import lax
from jax.experimental import pallas as pl
from jax.experimental.pallas import tpu as pltpu

# ---------------- configuration (mirrors CustomLSTM.__init__) ----------------
PADDING_VALUE = 0
EMBED_DIM = 8            # embedding_dim
INPUT_DIM = 5            # numeric features: x[:, :, 3:]
N_ENCODE = 3             # len(param.features_to_encode)
HIDDEN_DIM = 32          # hidden_dim
TARGET_DIM = 4           # target_dim
N_LAYERS = 2             # n_layers (fused explicitly in the kernel)
VOCAB = {"channel_init": 10, "env_first_url": 12, "env_last_url": 14}

D_IN = N_ENCODE * EMBED_DIM + INPUT_DIM   # 29: LSTM input size
D_PAD = 32                                # D_IN padded to a lane-friendly width
OUT_PAD = 128                             # scores padded to a full lane tile
NEG_INF = -1e9                            # bias for padded output classes

MAX_BATCH_BLOCK = 128    # rows per grid step (fills the MXU sublane dimension)
BATCH_ALIGN = 16         # bf16 sublane packing granularity for the batch dim
MAX_T_CHUNK = 64         # timesteps projected per chunk (bounds xg scratch / v7x VMEM)


def _round_up(v, m):
    return ((v + m - 1) // m) * m


def _pick_time_chunk(t_pad):
    """Largest divisor of t_pad that is <= MAX_T_CHUNK (bounds the xg scratch)."""
    for d in range(min(t_pad, MAX_T_CHUNK), 0, -1):
        if t_pad % d == 0:
            return d
    return 1


# ------------------------------- Pallas kernel -------------------------------
def lstm_kernel(x_ref, len_ref, wih0_ref, whh0_ref, b0_ref,
                w1_ref, b1_ref, wl_ref, bl_ref, scores_ref, xg_ref):
    """Fused 2-layer masked LSTM + linear head + log_softmax for one batch block.

    x_ref:   (T_pad, BB, D_PAD) bf16   time-major embedded input (zero-padded)
    len_ref: (BB, 1) i32               valid lengths (packed-sequence mask)
    wih0:    (D_PAD, 4H) bf16          layer-0 input weights (pre-transposed)
    whh0:    (H, 4H) f32               layer-0 recurrent weights
    w1:      (2H, 4H) f32              layer-1 [W_ih ; W_hh] stacked -> one matmul/step
    b0/b1:   (1, 4H) f32               combined b_ih + b_hh per layer
    wl/bl:   (H, OUT_PAD) / (1, OUT_PAD) f32  head (padded classes carry NEG_INF bias)
    scores:  (BB, OUT_PAD) f32         log-probabilities (valid classes in [:, :TARGET])
    xg_ref:  (T_CHUNK, BB, 4H) f32     scratch for the chunked hoisted input projection
    """
    t_pad, bb, d = x_ref.shape
    t_chunk = xg_ref.shape[0]
    n_chunks = t_pad // t_chunk
    h_dim = whh0_ref.shape[0]
    f32 = jnp.float32

    # hoisted: one lengths broadcast, reused by every per-step freeze mask
    lens_b = jnp.broadcast_to(len_ref[...], (bb, h_dim))

    def cell(gates, c_prev):
        # Full-width nonlinearities (one sigmoid + one tanh over all 4H lanes),
        # then 32-lane slices.  PyTorch gate order [i | f | g | o].
        # TODO(synk): pltpu.roll-based lane alignment could trim relayouts further.
        sig = jax.nn.sigmoid(gates)
        tnh = jnp.tanh(gates)
        i_g = sig[:, 0 * h_dim:1 * h_dim]
        f_g = sig[:, 1 * h_dim:2 * h_dim]
        g_g = tnh[:, 2 * h_dim:3 * h_dim]
        o_g = sig[:, 3 * h_dim:4 * h_dim]
        c_new = f_g * c_prev + i_g * g_g
        h_new = o_g * jnp.tanh(c_new)
        return h_new, c_new

    def chunk_body(ci, carry):
        t0 = ci * t_chunk
        # hoisted layer-0 input projection for this time chunk: ONE bf16 MXU matmul
        xc = x_ref[pl.ds(t0, t_chunk)]                               # (t_chunk, bb, d)
        xg = jnp.dot(xc.reshape(t_chunk * bb, d), wih0_ref[...],
                     preferred_element_type=f32) + b0_ref[...]
        xg_ref[...] = xg.reshape(t_chunk, bb, 4 * h_dim)

        def step_body(ts, st):
            h0, c0, h1, c1 = st
            m = lens_b > (t0 + ts)          # packed-seq semantics: freeze at t>=len
            # layer 0: only h @ W_hh on the serial critical path (f32 recurrence,
            # no per-step bf16 round-trip of the state)
            g0 = xg_ref[ts] + jnp.dot(h0, whh0_ref[...],
                                      preferred_element_type=f32)
            h0n, c0n = cell(g0, c0)
            h0 = jnp.where(m, h0n, h0)
            c0 = jnp.where(m, c0n, c0)
            # layer 1: single fused matmul  [h0 | h1] @ [W_ih1 ; W_hh1]
            g1 = jnp.dot(jnp.concatenate([h0, h1], axis=1), w1_ref[...],
                         preferred_element_type=f32) + b1_ref[...]
            h1n, c1n = cell(g1, c1)
            h1 = jnp.where(m, h1n, h1)
            c1 = jnp.where(m, c1n, c1)
            return (h0, c0, h1, c1)

        return lax.fori_loop(0, t_chunk, step_body, carry,
                             unroll=min(8, t_chunk))

    zeros = jnp.zeros((bb, h_dim), f32)
    carry = (zeros, zeros, zeros, zeros)
    if n_chunks == 1:                       # static: avoid a trivial outer loop
        carry = chunk_body(0, carry)
    else:
        carry = lax.fori_loop(0, n_chunks, chunk_body, carry)
    h1 = carry[2]

    # hn[-1] -> nn.Linear -> LogSoftmax(dim=1); padded classes carry NEG_INF bias
    # so their exp underflows to 0 and the softmax matches the unpadded one.
    logits = jnp.dot(h1, wl_ref[...], preferred_element_type=f32) + bl_ref[...]
    mx = jnp.max(logits, axis=1, keepdims=True)
    lse = mx + jnp.log(jnp.sum(jnp.exp(logits - mx), axis=1, keepdims=True))
    scores_ref[...] = logits - lse                                   # lane-dense store


# --------------------------------- wrapper -----------------------------------
def custom_lstm_forward(params, x, lengths):
    """x: (B, T, 3 + INPUT_DIM) float32 with integer codes in cols 0..2; lengths: (B,)."""
    B, T, _ = x.shape
    H = HIDDEN_DIM
    gate = 4 * H

    # --- batch tiling: large blocks fill the MXU; >=2 grid steps when possible (v7x) ---
    b16 = _round_up(B, BATCH_ALIGN)
    n_blocks = max(1, -(-b16 // MAX_BATCH_BLOCK))
    if n_blocks == 1 and b16 > BATCH_ALIGN:
        n_blocks = 2                               # keep both v7x TensorCores busy
    bb = min(MAX_BATCH_BLOCK, _round_up(-(-b16 // n_blocks), BATCH_ALIGN))
    b_pad = _round_up(b16, bb)

    # --- time tiling: chunk the hoisted projection so the xg scratch stays small ---
    t_pad = _round_up(T, 8)
    t_chunk = _pick_time_chunk(t_pad)

    # --- embeddings + concat, built TIME-MAJOR; only the small index / numeric ---
    # --- tensors are transposed, never the full activation                     ---
    idx_tm = jnp.transpose(x[:, :, :N_ENCODE].astype(jnp.int32), (1, 0, 2))   # (T,B,3)
    ch = params["emb_channel"][idx_tm[:, :, 0]]                               # (T,B,E)
    ef = params["emb_env_first"][idx_tm[:, :, 1]]
    el = params["emb_env_last"][idx_tm[:, :, 2]]
    num = jnp.transpose(x[:, :, N_ENCODE:], (1, 0, 2)).astype(jnp.float32)    # (T,B,5)
    x_tm = jnp.concatenate([ch, ef, el, num], axis=2)                         # (T,B,29)
    x_tm = jnp.pad(x_tm, ((0, t_pad - T), (0, b_pad - B), (0, D_PAD - D_IN)))
    x_tm = x_tm.astype(jnp.bfloat16)          # bf16 halves the HBM->VMEM x DMA bytes

    # padded batch rows get length 0 -> their state stays 0 and is sliced away below
    lens = jnp.pad(lengths.astype(jnp.int32), (0, b_pad - B)).reshape(b_pad, 1)

    def w_spec(r, c):   # whole (small) weight, same block every grid step
        return pl.BlockSpec((r, c), lambda i: (0, 0))

    # VMEM budget (double-buffered x/out/weights + xg scratch), clamped
    w_bytes = (D_PAD * gate * 2 + H * gate * 4 + 2 * H * gate * 4
               + 2 * gate * 4 + H * OUT_PAD * 4 + OUT_PAD * 4)
    need = (2 * (t_pad * bb * D_PAD * 2 + bb * OUT_PAD * 4 + bb * 4 + w_bytes)
            + t_chunk * bb * gate * 4 + (2 << 20))
    vmem_limit = int(min(max(need, 32 << 20), 96 << 20))

    cost = pl.CostEstimate(
        flops=int(2 * t_pad * b_pad * gate * (D_PAD + 3 * H)
                  + 2 * b_pad * H * OUT_PAD),
        transcendentals=int(t_pad * b_pad * N_LAYERS * (2 * gate + H)
                            + b_pad * OUT_PAD),
        bytes_accessed=int(x_tm.size * 2 + b_pad * 4
                           + (b_pad // bb) * w_bytes + b_pad * OUT_PAD * 4),
    )

    padded_scores = pl.pallas_call(
        lstm_kernel,
        out_shape=jax.ShapeDtypeStruct((b_pad, OUT_PAD), jnp.float32),
        grid=(b_pad // bb,),
        in_specs=[
            pl.BlockSpec((t_pad, bb, D_PAD), lambda i: (0, i, 0)),    # x (time-major)
            pl.BlockSpec((bb, 1), lambda i: (i, 0)),                  # lengths
            w_spec(D_PAD, gate), w_spec(H, gate), w_spec(1, gate),    # layer 0
            w_spec(2 * H, gate), w_spec(1, gate),                     # layer 1 (stacked)
            w_spec(H, OUT_PAD), w_spec(1, OUT_PAD),                   # linear head
        ],
        out_specs=pl.BlockSpec((bb, OUT_PAD), lambda i: (i, 0)),
        scratch_shapes=[pltpu.VMEM((t_chunk, bb, gate), jnp.float32)],
        compiler_params=pltpu.CompilerParams(
            dimension_semantics=("parallel",),    # batch tiles across cores (v7x)
            vmem_limit_bytes=vmem_limit,
        ),
        cost_estimate=cost,
    )(x_tm, lens, params["k_wih0"], params["k_whh0"], params["k_b0"],
      params["k_w1"], params["k_b1"], params["k_wl"], params["k_bl"])

    return padded_scores[:B, :TARGET_DIM]


# --------------------------- deterministic parameters ------------------------
def init_params(key):
    ks = jax.random.split(key, 11)

    def w(k, shape, scale=0.1):
        return jax.random.normal(k, shape, jnp.float32) * scale

    emb_channel = w(ks[0], (VOCAB["channel_init"] + 1, EMBED_DIM))
    emb_env_first = w(ks[1], (VOCAB["env_first_url"] + 1, EMBED_DIM))
    emb_env_last = w(ks[2], (VOCAB["env_last_url"] + 1, EMBED_DIM))
    # nn.Embedding(padding_idx=PADDING_VALUE): padding row is zero
    emb_channel = emb_channel.at[PADDING_VALUE].set(0.0)
    emb_env_first = emb_env_first.at[PADDING_VALUE].set(0.0)
    emb_env_last = emb_env_last.at[PADDING_VALUE].set(0.0)

    H = HIDDEN_DIM
    wih0 = w(ks[3], (4 * H, D_IN))
    whh0 = w(ks[4], (4 * H, H))
    b0 = w(ks[5], (1, 4 * H))          # combined b_ih + b_hh
    wih1 = w(ks[6], (4 * H, H))
    whh1 = w(ks[7], (4 * H, H))
    b1 = w(ks[8], (1, 4 * H))
    wl = w(ks[9], (TARGET_DIM, H))
    bl = w(ks[10], (1, TARGET_DIM))

    params = dict(
        emb_channel=emb_channel, emb_env_first=emb_env_first, emb_env_last=emb_env_last,
        wih0_t=wih0.T, whh0_t=whh0.T, b0=b0,
        wih1_t=wih1.T, whh1_t=whh1.T, b1=b1,
        wl_t=wl.T, bl=bl,
    )
    # kernel-layout weights prepared ONCE (review: hoist pad/cast/stack out of forward)
    params.update(
        k_wih0=jnp.pad(wih0.T, ((0, D_PAD - D_IN), (0, 0))).astype(jnp.bfloat16),
        k_whh0=whh0.T,                                                  # f32 recurrence
        k_b0=b0,
        k_w1=jnp.concatenate([wih1.T, whh1.T], axis=0),                 # (2H, 4H) stacked
        k_b1=b1,
        k_wl=jnp.pad(wl.T, ((0, 0), (0, OUT_PAD - TARGET_DIM))),
        k_bl=jnp.pad(bl, ((0, 0), (0, OUT_PAD - TARGET_DIM)),
                     constant_values=NEG_INF),
    )
    return params


# ------------------------------- pure-JAX reference --------------------------
def _ref_layer(x_tm, wih_t, whh_t, b, lengths):
    T, B, _ = x_tm.shape
    H = HIDDEN_DIM

    def step(carry, inp):
        h, c = carry
        x_t, t = inp
        gates = x_t @ wih_t + h @ whh_t + b
        i_g = jax.nn.sigmoid(gates[:, :H])
        f_g = jax.nn.sigmoid(gates[:, H:2 * H])
        g_g = jnp.tanh(gates[:, 2 * H:3 * H])
        o_g = jax.nn.sigmoid(gates[:, 3 * H:])
        c_new = f_g * c + i_g * g_g
        h_new = o_g * jnp.tanh(c_new)
        mask = (t < lengths)[:, None]
        h = jnp.where(mask, h_new, h)
        c = jnp.where(mask, c_new, c)
        return (h, c), h

    init = (jnp.zeros((B, H), jnp.float32), jnp.zeros((B, H), jnp.float32))
    (h, _), hs = lax.scan(step, init, (x_tm, jnp.arange(T)))
    return hs, h


def reference_forward(params, x, lengths):
    ch = params["emb_channel"][x[:, :, 0].astype(jnp.int32)]
    ef = params["emb_env_first"][x[:, :, 1].astype(jnp.int32)]
    el = params["emb_env_last"][x[:, :, 2].astype(jnp.int32)]
    num = x[:, :, N_ENCODE:].astype(jnp.float32)
    x_tm = jnp.transpose(jnp.concatenate([ch, ef, el, num], axis=2), (1, 0, 2))
    hs0, _ = _ref_layer(x_tm, params["wih0_t"], params["whh0_t"], params["b0"], lengths)
    _, h1 = _ref_layer(hs0, params["wih1_t"], params["whh1_t"], params["b1"], lengths)
    logits = h1 @ params["wl_t"] + params["bl"]
    return jax.nn.log_softmax(logits, axis=1)


# ----------------------------------- main -------------------------------------
if __name__ == "__main__":
    key = jax.random.PRNGKey(0)
    kp, k1, k2, k3, k4 = jax.random.split(key, 5)
    params = init_params(kp)

    B, T = 4, 8
    lengths = jnp.array([8, 5, 3, 6], dtype=jnp.int32)

    ch_idx = jax.random.randint(k1, (B, T), 1, VOCAB["channel_init"] + 1)
    ef_idx = jax.random.randint(k2, (B, T), 1, VOCAB["env_first_url"] + 1)
    el_idx = jax.random.randint(k3, (B, T), 1, VOCAB["env_last_url"] + 1)
    num = jax.random.normal(k4, (B, T, INPUT_DIM), jnp.float32)

    # pad positions beyond each sequence length (mimics a padded batch)
    valid = jnp.arange(T)[None, :] < lengths[:, None]
    ch_idx = jnp.where(valid, ch_idx, PADDING_VALUE)
    ef_idx = jnp.where(valid, ef_idx, PADDING_VALUE)
    el_idx = jnp.where(valid, el_idx, PADDING_VALUE)
    num = jnp.where(valid[:, :, None], num, 0.0)

    x = jnp.concatenate(
        [ch_idx[..., None].astype(jnp.float32),
         ef_idx[..., None].astype(jnp.float32),
         el_idx[..., None].astype(jnp.float32),
         num], axis=2)                                     # (B, T, 3 + INPUT_DIM)

    scores = jax.jit(custom_lstm_forward)(params, x, lengths)
    scores = jax.block_until_ready(scores)

    ref = reference_forward(params, x, lengths)
    assert scores.shape == (B, TARGET_DIM)
    max_err = float(jnp.max(jnp.abs(scores - ref)))
    # input projection uses bf16 MXU operands (f32 accumulation); the recurrence
    # itself is f32, so the error is dominated by one bf16 rounding per step.
    if max_err > 2e-2:
        raise AssertionError(f"Pallas kernel mismatch vs reference: max_err={max_err}")

    print("KERNEL_OK")
</pallas_src>

<mosaic_0001>
module attributes {stable_mosaic.version = 11 : i64} {
  func.func @lstm_kernel(%arg0: i32, %arg1: memref<8x16x32xbf16, #tpu.memory_space<vmem>>, %arg2: memref<16x1xi32, #tpu.memory_space<vmem>>, %arg3: memref<32x128xbf16, #tpu.memory_space<vmem>>, %arg4: memref<32x128xf32, #tpu.memory_space<vmem>>, %arg5: memref<1x128xf32, #tpu.memory_space<vmem>>, %arg6: memref<64x128xf32, #tpu.memory_space<vmem>>, %arg7: memref<1x128xf32, #tpu.memory_space<vmem>>, %arg8: memref<32x128xf32, #tpu.memory_space<vmem>>, %arg9: memref<1x128xf32, #tpu.memory_space<vmem>>, %arg10: memref<16x128xf32, #tpu.memory_space<vmem>>, %arg11: memref<8x16x128xf32, #tpu.memory_space<vmem>>) attributes {dimension_semantics = [#tpu.dimension_semantics<parallel>], iteration_bounds = array<i64: 1>, scalar_prefetch = 0 : i64, scratch_operands = 1 : i64, tpu.core_type = #tpu.core_type<tc>, window_params = [{transform_indices = @transform_0, window_bounds = array<i64: 8, 16, 32>}, {transform_indices = @transform_1, window_bounds = array<i64: 16, 1>}, {pipeline_mode = #tpu.pipeline_mode<synchronous>, transform_indices = @transform_2, window_bounds = array<i64: 32, 128>}, {pipeline_mode = #tpu.pipeline_mode<synchronous>, transform_indices = @transform_3, window_bounds = array<i64: 32, 128>}, {pipeline_mode = #tpu.pipeline_mode<synchronous>, transform_indices = @transform_4, window_bounds = array<i64: 1, 128>}, {pipeline_mode = #tpu.pipeline_mode<synchronous>, transform_indices = @transform_5, window_bounds = array<i64: 64, 128>}, {pipeline_mode = #tpu.pipeline_mode<synchronous>, transform_indices = @transform_6, window_bounds = array<i64: 1, 128>}, {pipeline_mode = #tpu.pipeline_mode<synchronous>, transform_indices = @transform_7, window_bounds = array<i64: 32, 128>}, {pipeline_mode = #tpu.pipeline_mode<synchronous>, transform_indices = @transform_8, window_bounds = array<i64: 1, 128>}, {transform_indices = @transform_9, window_bounds = array<i64: 16, 128>}]} {
    %c0 = arith.constant 0 : index
    %c0_0 = arith.constant 0 : index
    %0 = vector.load %arg2[%c0, %c0_0] : memref<16x1xi32, #tpu.memory_space<vmem>>, vector<16x1xi32>
    %1 = vector.shape_cast %0 : vector<16x1xi32> to vector<16x1xi32>
    %2 = vector.broadcast %1 : vector<16x1xi32> to vector<16x32xi32>
    %cst = arith.constant 0.000000e+00 : f32
    %3 = vector.broadcast %cst : f32 to vector<16x32xf32>
    %c0_1 = arith.constant 0 : index
    %c0_2 = arith.constant 0 : index
    %c0_3 = arith.constant 0 : index
    %4 = vector.load %arg1[%c0_1, %c0_2, %c0_3] : memref<8x16x32xbf16, #tpu.memory_space<vmem>>, vector<8x16x32xbf16>
    %5 = vector.shape_cast %4 : vector<8x16x32xbf16> to vector<128x32xbf16>
    %c0_4 = arith.constant 0 : index
    %c0_5 = arith.constant 0 : index
    %6 = vector.load %arg3[%c0_4, %c0_5] : memref<32x128xbf16, #tpu.memory_space<vmem>>, vector<32x128xbf16>
    %cst_6 = arith.constant dense<0.000000e+00> : vector<128x128xf32>
    %7 = tpu.matmul %5, %6, %cst_6 {dimension_numbers = #tpu.dot_dimension_numbers<[1], [0], [0], [1], [0, 0, 1, 1], [], []>} : vector<128x32xbf16>, vector<32x128xbf16>, vector<128x128xf32> -> vector<128x128xf32>
    %c0_7 = arith.constant 0 : index
    %c0_8 = arith.constant 0 : index
    %8 = vector.load %arg5[%c0_7, %c0_8] : memref<1x128xf32, #tpu.memory_space<vmem>>, vector<1x128xf32>
    %9 = vector.broadcast %8 : vector<1x128xf32> to vector<128x128xf32>
    %10 = arith.addf %7, %9 : vector<128x128xf32>
    %11 = vector.shape_cast %10 : vector<128x128xf32> to vector<8x16x128xf32>
    %c0_9 = arith.constant 0 : index
    %c0_10 = arith.constant 0 : index
    %c0_11 = arith.constant 0 : index
    %12 = vector.load %arg11[%c0_9, %c0_10, %c0_11] : memref<8x16x128xf32, #tpu.memory_space<vmem>>, vector<8x16x128xf32>
    tpu.vector_store %arg11[%c0_9, %c0_10, %c0_11], %11 {strides = array<i32>} : memref<8x16x128xf32, #tpu.memory_space<vmem>>, vector<8x16x128xf32>,
    %c0_i32 = arith.constant 0 : i32
    %c0_i32_12 = arith.constant 0 : i32
    %13 = arith.addi %c0_i32_12, %c0_i32 : i32
    %14 = vector.broadcast %13 : i32 to vector<16x32xi32>
    %15 = arith.cmpi sgt, %2, %14 : vector<16x32xi32>
    %16 = arith.index_cast %c0_i32 : i32 to index
    %c0_13 = arith.constant 0 : index
    %c0_14 = arith.constant 0 : index
    %17 = vector.load %arg11[%16, %c0_13, %c0_14] : memref<8x16x128xf32, #tpu.memory_space<vmem>>, vector<1x16x128xf32>
    %18 = vector.shape_cast %17 : vector<1x16x128xf32> to vector<16x128xf32>
    %c0_15 = arith.constant 0 : index
    %c0_16 = arith.constant 0 : index
    %19 = vector.load %arg4[%c0_15, %c0_16] : memref<32x128xf32, #tpu.memory_space<vmem>>, vector<32x128xf32>
    %cst_17 = arith.constant dense<0.000000e+00> : vector<16x128xf32>
    %20 = tpu.matmul %3, %19, %cst_17 {dimension_numbers = #tpu.dot_dimension_numbers<[1], [0], [0], [1], [0, 0, 1, 1], [], []>} : vector<16x32xf32>, vector<32x128xf32>, vector<16x128xf32> -> vector<16x128xf32>
    %21 = arith.addf %18, %20 : vector<16x128xf32>
    %22 = arith.negf %21 : vector<16x128xf32>
    %23 = math.exp %22 : vector<16x128xf32>
    %cst_18 = arith.constant 1.000000e+00 : f32
    %24 = vector.broadcast %cst_18 : f32 to vector<16x128xf32>
    %25 = arith.addf %24, %23 : vector<16x128xf32>
    %26 = arith.divf %24, %25 : vector<16x128xf32>
    %27 = math.tanh %21 : vector<16x128xf32>
    %28 = vector.extract_strided_slice %26 {offsets = [0, 0], sizes = [16, 32], strides = [1, 1]} : vector<16x128xf32> to vector<16x32xf32>
    %29 = vector.extract_strided_slice %26 {offsets = [0, 32], sizes = [16, 32], strides = [1, 1]} : vector<16x128xf32> to vector<16x32xf32>
    %30 = vector.extract_strided_slice %27 {offsets = [0, 64], sizes = [16, 32], strides = [1, 1]} : vector<16x128xf32> to vector<16x32xf32>
    %31 = vector.extract_strided_slice %26 {offsets = [0, 96], sizes = [16, 32], strides = [1, 1]} : vector<16x128xf32> to vector<16x32xf32>
    %32 = arith.mulf %29, %3 : vector<16x32xf32>
    %33 = arith.mulf %28, %30 : vector<16x32xf32>
    %34 = arith.addf %32, %33 : vector<16x32xf32>
    %35 = math.tanh %34 : vector<16x32xf32>
    %36 = arith.mulf %31, %35 : vector<16x32xf32>
    %37 = arith.select %15, %36, %3 : vector<16x32xi1>, vector<16x32xf32>
    %38 = arith.select %15, %34, %3 : vector<16x32xi1>, vector<16x32xf32>
    %39 = tpu.concatenate %37, %3 in 1 : vector<16x32xf32>, vector<16x32xf32> -> vector<16x64xf32>
    %c0_19 = arith.constant 0 : index
    %c0_20 = arith.constant 0 : index
    %40 = vector.load %arg6[%c0_19, %c0_20] : memref<64x128xf32, #tpu.memory_space<vmem>>, vector<64x128xf32>
    %cst_21 = arith.constant dense<0.000000e+00> : vector<16x128xf32>
    %41 = tpu.matmul %39, %40, %cst_21 {dimension_numbers = #tpu.dot_dimension_numbers<[1], [0], [0], [1], [0, 0, 1, 1], [], []>} : vector<16x64xf32>, vector<64x128xf32>, vector<16x128xf32> -> vector<16x128xf32>
    %c0_22 = arith.constant 0 : index
    %c0_23 = arith.constant 0 : index
    %42 = vector.load %arg7[%c0_22, %c0_23] : memref<1x128xf32, #tpu.memory_space<vmem>>, vector<1x128xf32>
    %43 = vector.broadcast %42 : vector<1x128xf32> to vector<16x128xf32>
    %44 = arith.addf %41, %43 : vector<16x128xf32>
    %45 = arith.negf %44 : vector<16x128xf32>
    %46 = math.exp %45 : vector<16x128xf32>
    %cst_24 = arith.constant 1.000000e+00 : f32
    %47 = vector.broadcast %cst_24 : f32 to vector<16x128xf32>
    %48 = arith.addf %47, %46 : vector<16x128xf32>
    %49 = arith.divf %47, %48 : vector<16x128xf32>
    %50 = math.tanh %44 : vector<16x128xf32>
    %51 = vector.extract_strided_slice %49 {offsets = [0, 0], sizes = [16, 32], strides = [1, 1]} : vector<16x128xf32> to vector<16x32xf32>
    %52 = vector.extract_strided_slice %49 {offsets = [0, 32], sizes = [16, 32], strides = [1, 1]} : vector<16x128xf32> to vector<16x32xf32>
    %53 = vector.extract_strided_slice %50 {offsets = [0, 64], sizes = [16, 32], strides = [1, 1]} : vector<16x128xf32> to vector<16x32xf32>
    %54 = vector.extract_strided_slice %49 {offsets = [0, 96], sizes = [16, 32], strides = [1, 1]} : vector<16x128xf32> to vector<16x32xf32>
    %55 = arith.mulf %52, %3 : vector<16x32xf32>
    %56 = arith.mulf %51, %53 : vector<16x32xf32>
    %57 = arith.addf %55, %56 : vector<16x32xf32>
    %58 = math.tanh %57 : vector<16x32xf32>
    %59 = arith.mulf %54, %58 : vector<16x32xf32>
    %60 = arith.select %15, %59, %3 : vector<16x32xi1>, vector<16x32xf32>
    %61 = arith.select %15, %57, %3 : vector<16x32xi1>, vector<16x32xf32>
    %c1_i32 = arith.constant 1 : i32
    %c0_i32_25 = arith.constant 0 : i32
    %62 = arith.addi %c0_i32_25, %c1_i32 : i32
    %63 = vector.broadcast %62 : i32 to vector<16x32xi32>
    %64 = arith.cmpi sgt, %2, %63 : vector<16x32xi32>
    %65 = arith.index_cast %c1_i32 : i32 to index
    %c0_26 = arith.constant 0 : index
    %c0_27 = arith.constant 0 : index
    %66 = vector.load %arg11[%65, %c0_26, %c0_27] : memref<8x16x128xf32, #tpu.memory_space<vmem>>, vector<1x16x128xf32>
    %67 = vector.shape_cast %66 : vector<1x16x128xf32> to vector<16x128xf32>
    %c0_28 = arith.constant 0 : index
    %c0_29 = arith.constant 0 : index
    %68 = vector.load %arg4[%c0_28, %c0_29] : memref<32x128xf32, #tpu.memory_space<vmem>>, vector<32x128xf32>
    %cst_30 = arith.constant dense<0.000000e+00> : vector<16x128xf32>
    %69 = tpu.matmul %37, %68, %cst_30 {dimension_numbers = #tpu.dot_dimension_numbers<[1], [0], [0], [1], [0, 0, 1, 1], [], []>} : vector<16x32xf32>, vector<32x128xf32>, vector<16x128xf32> -> vector<16x128xf32>
    %70 = arith.addf %67, %69 : vector<16x128xf32>
    %71 = arith.negf %70 : vector<16x128xf32>
    %72 = math.exp %71 : vector<16x128xf32>
    %cst_31 = arith.constant 1.000000e+00 : f32
    %73 = vector.broadcast %cst_31 : f32 to vector<16x128xf32>
    %74 = arith.addf %73, %72 : vector<16x128xf32>
    %75 = arith.divf %73, %74 : vector<16x128xf32>
    %76 = math.tanh %70 : vector<16x128xf32>
    %77 = vector.extract_strided_slice %75 {offsets = [0, 0], sizes = [16, 32], strides = [1, 1]} : vector<16x128xf32> to vector<16x32xf32>
    %78 = vector.extract_strided_slice %75 {offsets = [0, 32], sizes = [16, 32], strides = [1, 1]} : vector<16x128xf32> to vector<16x32xf32>
    %79 = vector.extract_strided_slice %76 {offsets = [0, 64], sizes = [16, 32], strides = [1, 1]} : vector<16x128xf32> to vector<16x32xf32>
    %80 = vector.extract_strided_slice %75 {offsets = [0, 96], sizes = [16, 32], strides = [1, 1]} : vector<16x128xf32> to vector<16x32xf32>
    %81 = arith.mulf %78, %38 : vector<16x32xf32>
    %82 = arith.mulf %77, %79 : vector<16x32xf32>
    %83 = arith.addf %81, %82 : vector<16x32xf32>
    %84 = math.tanh %83 : vector<16x32xf32>
    %85 = arith.mulf %80, %84 : vector<16x32xf32>
    %86 = arith.select %64, %85, %37 : vector<16x32xi1>, vector<16x32xf32>
    %87 = arith.select %64, %83, %38 : vector<16x32xi1>, vector<16x32xf32>
    %88 = tpu.concatenate %86, %60 in 1 : vector<16x32xf32>, vector<16x32xf32> -> vector<16x64xf32>
    %c0_32 = arith.constant 0 : index
    %c0_33 = arith.constant 0 : index
    %89 = vector.load %arg6[%c0_32, %c0_33] : memref<64x128xf32, #tpu.memory_space<vmem>>, vector<64x128xf32>
    %cst_34 = arith.constant dense<0.000000e+00> : vector<16x128xf32>
    %90 = tpu.matmul %88, %89, %cst_34 {dimension_numbers = #tpu.dot_dimension_numbers<[1], [0], [0], [1], [0, 0, 1, 1], [], []>} : vector<16x64xf32>, vector<64x128xf32>, vector<16x128xf32> -> vector<16x128xf32>
    %c0_35 = arith.constant 0 : index
    %c0_36 = arith.constant 0 : index
    %91 = vector.load %arg7[%c0_35, %c0_36] : memref<1x128xf32, #tpu.memory_space<vmem>>, vector<1x128xf32>
    %92 = vector.broadcast %91 : vector<1x128xf32> to vector<16x128xf32>
    %93 = arith.addf %90, %92 : vector<16x128xf32>
    %94 = arith.negf %93 : vector<16x128xf32>
    %95 = math.exp %94 : vector<16x128xf32>
    %cst_37 = arith.constant 1.000000e+00 : f32
    %96 = vector.broadcast %cst_37 : f32 to vector<16x128xf32>
    %97 = arith.addf %96, %95 : vector<16x128xf32>
    %98 = arith.divf %96, %97 : vector<16x128xf32>
    %99 = math.tanh %93 : vector<16x128xf32>
    %100 = vector.extract_strided_slice %98 {offsets = [0, 0], sizes = [16, 32], strides = [1, 1]} : vector<16x128xf32> to vector<16x32xf32>
    %101 = vector.extract_strided_slice %98 {offsets = [0, 32], sizes = [16, 32], strides = [1, 1]} : vector<16x128xf32> to vector<16x32xf32>
    %102 = vector.extract_strided_slice %99 {offsets = [0, 64], sizes = [16, 32], strides = [1, 1]} : vector<16x128xf32> to vector<16x32xf32>
    %103 = vector.extract_strided_slice %98 {offsets = [0, 96], sizes = [16, 32], strides = [1, 1]} : vector<16x128xf32> to vector<16x32xf32>
    %104 = arith.mulf %101, %61 : vector<16x32xf32>
    %105 = arith.mulf %100, %102 : vector<16x32xf32>
    %106 = arith.addf %104, %105 : vector<16x32xf32>
    %107 = math.tanh %106 : vector<16x32xf32>
    %108 = arith.mulf %103, %107 : vector<16x32xf32>
    %109 = arith.select %64, %108, %60 : vector<16x32xi1>, vector<16x32xf32>
    %110 = arith.select %64, %106, %61 : vector<16x32xi1>, vector<16x32xf32>
    %c2_i32 = arith.constant 2 : i32
    %c0_i32_38 = arith.constant 0 : i32
    %111 = arith.addi %c0_i32_38, %c2_i32 : i32
    %112 = vector.broadcast %111 : i32 to vector<16x32xi32>
    %113 = arith.cmpi sgt, %2, %112 : vector<16x32xi32>
    %114 = arith.index_cast %c2_i32 : i32 to index
    %c0_39 = arith.constant 0 : index
    %c0_40 = arith.constant 0 : index
    %115 = vector.load %arg11[%114, %c0_39, %c0_40] : memref<8x16x128xf32, #tpu.memory_space<vmem>>, vector<1x16x128xf32>
    %116 = vector.shape_cast %115 : vector<1x16x128xf32> to vector<16x128xf32>
    %c0_41 = arith.constant 0 : index
    %c0_42 = arith.constant 0 : index
    %117 = vector.load %arg4[%c0_41, %c0_42] : memref<32x128xf32, #tpu.memory_space<vmem>>, vector<32x128xf32>
    %cst_43 = arith.constant dense<0.000000e+00> : vector<16x128xf32>
    %118 = tpu.matmul %86, %117, %cst_43 {dimension_numbers = #tpu.dot_dimension_numbers<[1], [0], [0], [1], [0, 0, 1, 1], [], []>} : vector<16x32xf32>, vector<32x128xf32>, vector<16x128xf32> -> vector<16x128xf32>
    %119 = arith.addf %116, %118 : vector<16x128xf32>
    %120 = arith.negf %119 : vector<16x128xf32>
    %121 = math.exp %120 : vector<16x128xf32>
    %cst_44 = arith.constant 1.000000e+00 : f32
    %122 = vector.broadcast %cst_44 : f32 to vector<16x128xf32>
    %123 = arith.addf %122, %121 : vector<16x128xf32>
    %124 = arith.divf %122, %123 : vector<16x128xf32>
    %125 = math.tanh %119 : vector<16x128xf32>
    %126 = vector.extract_strided_slice %124 {offsets = [0, 0], sizes = [16, 32], strides = [1, 1]} : vector<16x128xf32> to vector<16x32xf32>
    %127 = vector.extract_strided_slice %124 {offsets = [0, 32], sizes = [16, 32], strides = [1, 1]} : vector<16x128xf32> to vector<16x32xf32>
    %128 = vector.extract_strided_slice %125 {offsets = [0, 64], sizes = [16, 32], strides = [1, 1]} : vector<16x128xf32> to vector<16x32xf32>
    %129 = vector.extract_strided_slice %124 {offsets = [0, 96], sizes = [16, 32], strides = [1, 1]} : vector<16x128xf32> to vector<16x32xf32>
    %130 = arith.mulf %127, %87 : vector<16x32xf32>
    %131 = arith.mulf %126, %128 : vector<16x32xf32>
    %132 = arith.addf %130, %131 : vector<16x32xf32>
    %133 = math.tanh %132 : vector<16x32xf32>
    %134 = arith.mulf %129, %133 : vector<16x32xf32>
    %135 = arith.select %113, %134, %86 : vector<16x32xi1>, vector<16x32xf32>
    %136 = arith.select %113, %132, %87 : vector<16x32xi1>, vector<16x32xf32>
    %137 = tpu.concatenate %135, %109 in 1 : vector<16x32xf32>, vector<16x32xf32> -> vector<16x64xf32>
    %c0_45 = arith.constant 0 : index
    %c0_46 = arith.constant 0 : index
    %138 = vector.load %arg6[%c0_45, %c0_46] : memref<64x128xf32, #tpu.memory_space<vmem>>, vector<64x128xf32>
    %cst_47 = arith.constant dense<0.000000e+00> : vector<16x128xf32>
    %139 = tpu.matmul %137, %138, %cst_47 {dimension_numbers = #tpu.dot_dimension_numbers<[1], [0], [0], [1], [0, 0, 1, 1], [], []>} : vector<16x64xf32>, vector<64x128xf32>, vector<16x128xf32> -> vector<16x128xf32>
    %c0_48 = arith.constant 0 : index
    %c0_49 = arith.constant 0 : index
    %140 = vector.load %arg7[%c0_48, %c0_49] : memref<1x128xf32, #tpu.memory_space<vmem>>, vector<1x128xf32>
    %141 = vector.broadcast %140 : vector<1x128xf32> to vector<16x128xf32>
    %142 = arith.addf %139, %141 : vector<16x128xf32>
    %143 = arith.negf %142 : vector<16x128xf32>
    %144 = math.exp %143 : vector<16x128xf32>
    %cst_50 = arith.constant 1.000000e+00 : f32
    %145 = vector.broadcast %cst_50 : f32 to vector<16x128xf32>
    %146 = arith.addf %145, %144 : vector<16x128xf32>
    %147 = arith.divf %145, %146 : vector<16x128xf32>
    %148 = math.tanh %142 : vector<16x128xf32>
    %149 = vector.extract_strided_slice %147 {offsets = [0, 0], sizes = [16, 32], strides = [1, 1]} : vector<16x128xf32> to vector<16x32xf32>
    %150 = vector.extract_strided_slice %147 {offsets = [0, 32], sizes = [16, 32], strides = [1, 1]} : vector<16x128xf32> to vector<16x32xf32>
    %151 = vector.extract_strided_slice %148 {offsets = [0, 64], sizes = [16, 32], strides = [1, 1]} : vector<16x128xf32> to vector<16x32xf32>
    %152 = vector.extract_strided_slice %147 {offsets = [0, 96], sizes = [16, 32], strides = [1, 1]} : vector<16x128xf32> to vector<16x32xf32>
    %153 = arith.mulf %150, %110 : vector<16x32xf32>
    %154 = arith.mulf %149, %151 : vector<16x32xf32>
    %155 = arith.addf %153, %154 : vector<16x32xf32>
    %156 = math.tanh %155 : vector<16x32xf32>
    %157 = arith.mulf %152, %156 : vector<16x32xf32>
    %158 = arith.select %113, %157, %109 : vector<16x32xi1>, vector<16x32xf32>
    %159 = arith.select %113, %155, %110 : vector<16x32xi1>, vector<16x32xf32>
    %c3_i32 = arith.constant 3 : i32
    %c0_i32_51 = arith.constant 0 : i32
    %160 = arith.addi %c0_i32_51, %c3_i32 : i32
    %161 = vector.broadcast %160 : i32 to vector<16x32xi32>
    %162 = arith.cmpi sgt, %2, %161 : vector<16x32xi32>
    %163 = arith.index_cast %c3_i32 : i32 to index
    %c0_52 = arith.constant 0 : index
    %c0_53 = arith.constant 0 : index
    %164 = vector.load %arg11[%163, %c0_52, %c0_53] : memref<8x16x128xf32, #tpu.memory_space<vmem>>, vector<1x16x128xf32>
    %165 = vector.shape_cast %164 : vector<1x16x128xf32> to vector<16x128xf32>
    %c0_54 = arith.constant 0 : index
    %c0_55 = arith.constant 0 : index
    %166 = vector.load %arg4[%c0_54, %c0_55] : memref<32x128xf32, #tpu.memory_space<vmem>>, vector<32x128xf32>
    %cst_56 = arith.constant dense<0.000000e+00> : vector<16x128xf32>
    %167 = tpu.matmul %135, %166, %cst_56 {dimension_numbers = #tpu.dot_dimension_numbers<[1], [0], [0], [1], [0, 0, 1, 1], [], []>} : vector<16x32xf32>, vector<32x128xf32>, vector<16x128xf32> -> vector<16x128xf32>
    %168 = arith.addf %165, %167 : vector<16x128xf32>
    %169 = arith.negf %168 : vector<16x128xf32>
    %170 = math.exp %169 : vector<16x128xf32>
    %cst_57 = arith.constant 1.000000e+00 : f32
    %171 = vector.broadcast %cst_57 : f32 to vector<16x128xf32>
    %172 = arith.addf %171, %170 : vector<16x128xf32>
    %173 = arith.divf %171, %172 : vector<16x128xf32>
    %174 = math.tanh %168 : vector<16x128xf32>
    %175 = vector.extract_strided_slice %173 {offsets = [0, 0], sizes = [16, 32], strides = [1, 1]} : vector<16x128xf32> to vector<16x32xf32>
    %176 = vector.extract_strided_slice %173 {offsets = [0, 32], sizes = [16, 32], strides = [1, 1]} : vector<16x128xf32> to vector<16x32xf32>
    %177 = vector.extract_strided_slice %174 {offsets = [0, 64], sizes = [16, 32], strides = [1, 1]} : vector<16x128xf32> to vector<16x32xf32>
    %178 = vector.extract_strided_slice %173 {offsets = [0, 96], sizes = [16, 32], strides = [1, 1]} : vector<16x128xf32> to vector<16x32xf32>
    %179 = arith.mulf %176, %136 : vector<16x32xf32>
    %180 = arith.mulf %175, %177 : vector<16x32xf32>
    %181 = arith.addf %179, %180 : vector<16x32xf32>
    %182 = math.tanh %181 : vector<16x32xf32>
    %183 = arith.mulf %178, %182 : vector<16x32xf32>
    %184 = arith.select %162, %183, %135 : vector<16x32xi1>, vector<16x32xf32>
    %185 = arith.select %162, %181, %136 : vector<16x32xi1>, vector<16x32xf32>
    %186 = tpu.concatenate %184, %158 in 1 : vector<16x32xf32>, vector<16x32xf32> -> vector<16x64xf32>
    %c0_58 = arith.constant 0 : index
    %c0_59 = arith.constant 0 : index
    %187 = vector.load %arg6[%c0_58, %c0_59] : memref<64x128xf32, #tpu.memory_space<vmem>>, vector<64x128xf32>
    %cst_60 = arith.constant dense<0.000000e+00> : vector<16x128xf32>
    %188 = tpu.matmul %186, %187, %cst_60 {dimension_numbers = #tpu.dot_dimension_numbers<[1], [0], [0], [1], [0, 0, 1, 1], [], []>} : vector<16x64xf32>, vector<64x128xf32>, vector<16x128xf32> -> vector<16x128xf32>
    %c0_61 = arith.constant 0 : index
    %c0_62 = arith.constant 0 : index
    %189 = vector.load %arg7[%c0_61, %c0_62] : memref<1x128xf32, #tpu.memory_space<vmem>>, vector<1x128xf32>
    %190 = vector.broadcast %189 : vector<1x128xf32> to vector<16x128xf32>
    %191 = arith.addf %188, %190 : vector<16x128xf32>
    %192 = arith.negf %191 : vector<16x128xf32>
    %193 = math.exp %192 : vector<16x128xf32>
    %cst_63 = arith.constant 1.000000e+00 : f32
    %194 = vector.broadcast %cst_63 : f32 to vector<16x128xf32>
    %195 = arith.addf %194, %193 : vector<16x128xf32>
    %196 = arith.divf %194, %195 : vector<16x128xf32>
    %197 = math.tanh %191 : vector<16x128xf32>
    %198 = vector.extract_strided_slice %196 {offsets = [0, 0], sizes = [16, 32], strides = [1, 1]} : vector<16x128xf32> to vector<16x32xf32>
    %199 = vector.extract_strided_slice %196 {offsets = [0, 32], sizes = [16, 32], strides = [1, 1]} : vector<16x128xf32> to vector<16x32xf32>
    %200 = vector.extract_strided_slice %197 {offsets = [0, 64], sizes = [16, 32], strides = [1, 1]} : vector<16x128xf32> to vector<16x32xf32>
    %201 = vector.extract_strided_slice %196 {offsets = [0, 96], sizes = [16, 32], strides = [1, 1]} : vector<16x128xf32> to vector<16x32xf32>
    %202 = arith.mulf %199, %159 : vector<16x32xf32>
    %203 = arith.mulf %198, %200 : vector<16x32xf32>
    %204 = arith.addf %202, %203 : vector<16x32xf32>
    %205 = math.tanh %204 : vector<16x32xf32>
    %206 = arith.mulf %201, %205 : vector<16x32xf32>
    %207 = arith.select %162, %206, %158 : vector<16x32xi1>, vector<16x32xf32>
    %208 = arith.select %162, %204, %159 : vector<16x32xi1>, vector<16x32xf32>
    %c4_i32 = arith.constant 4 : i32
    %c0_i32_64 = arith.constant 0 : i32
    %209 = arith.addi %c0_i32_64, %c4_i32 : i32
    %210 = vector.broadcast %209 : i32 to vector<16x32xi32>
    %211 = arith.cmpi sgt, %2, %210 : vector<16x32xi32>
    %212 = arith.index_cast %c4_i32 : i32 to index
    %c0_65 = arith.constant 0 : index
    %c0_66 = arith.constant 0 : index
    %213 = vector.load %arg11[%212, %c0_65, %c0_66] : memref<8x16x128xf32, #tpu.memory_space<vmem>>, vector<1x16x128xf32>
    %214 = vector.shape_cast %213 : vector<1x16x128xf32> to vector<16x128xf32>
    %c0_67 = arith.constant 0 : index
    %c0_68 = arith.constant 0 : index
    %215 = vector.load %arg4[%c0_67, %c0_68] : memref<32x128xf32, #tpu.memory_space<vmem>>, vector<32x128xf32>
    %cst_69 = arith.constant dense<0.000000e+00> : vector<16x128xf32>
    %216 = tpu.matmul %184, %215, %cst_69 {dimension_numbers = #tpu.dot_dimension_numbers<[1], [0], [0], [1], [0, 0, 1, 1], [], []>} : vector<16x32xf32>, vector<32x128xf32>, vector<16x128xf32> -> vector<16x128xf32>
    %217 = arith.addf %214, %216 : vector<16x128xf32>
    %218 = arith.negf %217 : vector<16x128xf32>
    %219 = math.exp %218 : vector<16x128xf32>
    %cst_70 = arith.constant 1.000000e+00 : f32
    %220 = vector.broadcast %cst_70 : f32 to vector<16x128xf32>
    %221 = arith.addf %220, %219 : vector<16x128xf32>
    %222 = arith.divf %220, %221 : vector<16x128xf32>
    %223 = math.tanh %217 : vector<16x128xf32>
    %224 = vector.extract_strided_slice %222 {offsets = [0, 0], sizes = [16, 32], strides = [1, 1]} : vector<16x128xf32> to vector<16x32xf32>
    %225 = vector.extract_strided_slice %222 {offsets = [0, 32], sizes = [16, 32], strides = [1, 1]} : vector<16x128xf32> to vector<16x32xf32>
    %226 = vector.extract_strided_slice %223 {offsets = [0, 64], sizes = [16, 32], strides = [1, 1]} : vector<16x128xf32> to vector<16x32xf32>
    %227 = vector.extract_strided_slice %222 {offsets = [0, 96], sizes = [16, 32], strides = [1, 1]} : vector<16x128xf32> to vector<16x32xf32>
    %228 = arith.mulf %225, %185 : vector<16x32xf32>
    %229 = arith.mulf %224, %226 : vector<16x32xf32>
    %230 = arith.addf %228, %229 : vector<16x32xf32>
    %231 = math.tanh %230 : vector<16x32xf32>
    %232 = arith.mulf %227, %231 : vector<16x32xf32>
    %233 = arith.select %211, %232, %184 : vector<16x32xi1>, vector<16x32xf32>
    %234 = arith.select %211, %230, %185 : vector<16x32xi1>, vector<16x32xf32>
    %235 = tpu.concatenate %233, %207 in 1 : vector<16x32xf32>, vector<16x32xf32> -> vector<16x64xf32>
    %c0_71 = arith.constant 0 : index
    %c0_72 = arith.constant 0 : index
    %236 = vector.load %arg6[%c0_71, %c0_72] : memref<64x128xf32, #tpu.memory_space<vmem>>, vector<64x128xf32>
    %cst_73 = arith.constant dense<0.000000e+00> : vector<16x128xf32>
    %237 = tpu.matmul %235, %236, %cst_73 {dimension_numbers = #tpu.dot_dimension_numbers<[1], [0], [0], [1], [0, 0, 1, 1], [], []>} : vector<16x64xf32>, vector<64x128xf32>, vector<16x128xf32> -> vector<16x128xf32>
    %c0_74 = arith.constant 0 : index
    %c0_75 = arith.constant 0 : index
    %238 = vector.load %arg7[%c0_74, %c0_75] : memref<1x128xf32, #tpu.memory_space<vmem>>, vector<1x128xf32>
    %239 = vector.broadcast %238 : vector<1x128xf32> to vector<16x128xf32>
    %240 = arith.addf %237, %239 : vector<16x128xf32>
    %241 = arith.negf %240 : vector<16x128xf32>
    %242 = math.exp %241 : vector<16x128xf32>
    %cst_76 = arith.constant 1.000000e+00 : f32
    %243 = vector.broadcast %cst_76 : f32 to vector<16x128xf32>
    %244 = arith.addf %243, %242 : vector<16x128xf32>
    %245 = arith.divf %243, %244 : vector<16x128xf32>
    %246 = math.tanh %240 : vector<16x128xf32>
    %247 = vector.extract_strided_slice %245 {offsets = [0, 0], sizes = [16, 32], strides = [1, 1]} : vector<16x128xf32> to vector<16x32xf32>
    %248 = vector.extract_strided_slice %245 {offsets = [0, 32], sizes = [16, 32], strides = [1, 1]} : vector<16x128xf32> to vector<16x32xf32>
    %249 = vector.extract_strided_slice %246 {offsets = [0, 64], sizes = [16, 32], strides = [1, 1]} : vector<16x128xf32> to vector<16x32xf32>
    %250 = vector.extract_strided_slice %245 {offsets = [0, 96], sizes = [16, 32], strides = [1, 1]} : vector<16x128xf32> to vector<16x32xf32>
    %251 = arith.mulf %248, %208 : vector<16x32xf32>
    %252 = arith.mulf %247, %249 : vector<16x32xf32>
    %253 = arith.addf %251, %252 : vector<16x32xf32>
    %254 = math.tanh %253 : vector<16x32xf32>
    %255 = arith.mulf %250, %254 : vector<16x32xf32>
    %256 = arith.select %211, %255, %207 : vector<16x32xi1>, vector<16x32xf32>
    %257 = arith.select %211, %253, %208 : vector<16x32xi1>, vector<16x32xf32>
    %c5_i32 = arith.constant 5 : i32
    %c0_i32_77 = arith.constant 0 : i32
    %258 = arith.addi %c0_i32_77, %c5_i32 : i32
    %259 = vector.broadcast %258 : i32 to vector<16x32xi32>
    %260 = arith.cmpi sgt, %2, %259 : vector<16x32xi32>
    %261 = arith.index_cast %c5_i32 : i32 to index
    %c0_78 = arith.constant 0 : index
    %c0_79 = arith.constant 0 : index
    %262 = vector.load %arg11[%261, %c0_78, %c0_79] : memref<8x16x128xf32, #tpu.memory_space<vmem>>, vector<1x16x128xf32>
    %263 = vector.shape_cast %262 : vector<1x16x128xf32> to vector<16x128xf32>
    %c0_80 = arith.constant 0 : index
    %c0_81 = arith.constant 0 : index
    %264 = vector.load %arg4[%c0_80, %c0_81] : memref<32x128xf32, #tpu.memory_space<vmem>>, vector<32x128xf32>
    %cst_82 = arith.constant dense<0.000000e+00> : vector<16x128xf32>
    %265 = tpu.matmul %233, %264, %cst_82 {dimension_numbers = #tpu.dot_dimension_numbers<[1], [0], [0], [1], [0, 0, 1, 1], [], []>} : vector<16x32xf32>, vector<32x128xf32>, vector<16x128xf32> -> vector<16x128xf32>
    %266 = arith.addf %263, %265 : vector<16x128xf32>
    %267 = arith.negf %266 : vector<16x128xf32>
    %268 = math.exp %267 : vector<16x128xf32>
    %cst_83 = arith.constant 1.000000e+00 : f32
    %269 = vector.broadcast %cst_83 : f32 to vector<16x128xf32>
    %270 = arith.addf %269, %268 : vector<16x128xf32>
    %271 = arith.divf %269, %270 : vector<16x128xf32>
    %272 = math.tanh %266 : vector<16x128xf32>
    %273 = vector.extract_strided_slice %271 {offsets = [0, 0], sizes = [16, 32], strides = [1, 1]} : vector<16x128xf32> to vector<16x32xf32>
    %274 = vector.extract_strided_slice %271 {offsets = [0, 32], sizes = [16, 32], strides = [1, 1]} : vector<16x128xf32> to vector<16x32xf32>
    %275 = vector.extract_strided_slice %272 {offsets = [0, 64], sizes = [16, 32], strides = [1, 1]} : vector<16x128xf32> to vector<16x32xf32>
    %276 = vector.extract_strided_slice %271 {offsets = [0, 96], sizes = [16, 32], strides = [1, 1]} : vector<16x128xf32> to vector<16x32xf32>
    %277 = arith.mulf %274, %234 : vector<16x32xf32>
    %278 = arith.mulf %273, %275 : vector<16x32xf32>
    %279 = arith.addf %277, %278 : vector<16x32xf32>
    %280 = math.tanh %279 : vector<16x32xf32>
    %281 = arith.mulf %276, %280 : vector<16x32xf32>
    %282 = arith.select %260, %281, %233 : vector<16x32xi1>, vector<16x32xf32>
    %283 = arith.select %260, %279, %234 : vector<16x32xi1>, vector<16x32xf32>
    %284 = tpu.concatenate %282, %256 in 1 : vector<16x32xf32>, vector<16x32xf32> -> vector<16x64xf32>
    %c0_84 = arith.constant 0 : index
    %c0_85 = arith.constant 0 : index
    %285 = vector.load %arg6[%c0_84, %c0_85] : memref<64x128xf32, #tpu.memory_space<vmem>>, vector<64x128xf32>
    %cst_86 = arith.constant dense<0.000000e+00> : vector<16x128xf32>
    %286 = tpu.matmul %284, %285, %cst_86 {dimension_numbers = #tpu.dot_dimension_numbers<[1], [0], [0], [1], [0, 0, 1, 1], [], []>} : vector<16x64xf32>, vector<64x128xf32>, vector<16x128xf32> -> vector<16x128xf32>
    %c0_87 = arith.constant 0 : index
    %c0_88 = arith.constant 0 : index
    %287 = vector.load %arg7[%c0_87, %c0_88] : memref<1x128xf32, #tpu.memory_space<vmem>>, vector<1x128xf32>
    %288 = vector.broadcast %287 : vector<1x128xf32> to vector<16x128xf32>
    %289 = arith.addf %286, %288 : vector<16x128xf32>
    %290 = arith.negf %289 : vector<16x128xf32>
    %291 = math.exp %290 : vector<16x128xf32>
    %cst_89 = arith.constant 1.000000e+00 : f32
    %292 = vector.broadcast %cst_89 : f32 to vector<16x128xf32>
    %293 = arith.addf %292, %291 : vector<16x128xf32>
    %294 = arith.divf %292, %293 : vector<16x128xf32>
    %295 = math.tanh %289 : vector<16x128xf32>
    %296 = vector.extract_strided_slice %294 {offsets = [0, 0], sizes = [16, 32], strides = [1, 1]} : vector<16x128xf32> to vector<16x32xf32>
    %297 = vector.extract_strided_slice %294 {offsets = [0, 32], sizes = [16, 32], strides = [1, 1]} : vector<16x128xf32> to vector<16x32xf32>
    %298 = vector.extract_strided_slice %295 {offsets = [0, 64], sizes = [16, 32], strides = [1, 1]} : vector<16x128xf32> to vector<16x32xf32>
    %299 = vector.extract_strided_slice %294 {offsets = [0, 96], sizes = [16, 32], strides = [1, 1]} : vector<16x128xf32> to vector<16x32xf32>
    %300 = arith.mulf %297, %257 : vector<16x32xf32>
    %301 = arith.mulf %296, %298 : vector<16x32xf32>
    %302 = arith.addf %300, %301 : vector<16x32xf32>
    %303 = math.tanh %302 : vector<16x32xf32>
    %304 = arith.mulf %299, %303 : vector<16x32xf32>
    %305 = arith.select %260, %304, %256 : vector<16x32xi1>, vector<16x32xf32>
    %306 = arith.select %260, %302, %257 : vector<16x32xi1>, vector<16x32xf32>
    %c6_i32 = arith.constant 6 : i32
    %c0_i32_90 = arith.constant 0 : i32
    %307 = arith.addi %c0_i32_90, %c6_i32 : i32
    %308 = vector.broadcast %307 : i32 to vector<16x32xi32>
    %309 = arith.cmpi sgt, %2, %308 : vector<16x32xi32>
    %310 = arith.index_cast %c6_i32 : i32 to index
    %c0_91 = arith.constant 0 : index
    %c0_92 = arith.constant 0 : index
    %311 = vector.load %arg11[%310, %c0_91, %c0_92] : memref<8x16x128xf32, #tpu.memory_space<vmem>>, vector<1x16x128xf32>
    %312 = vector.shape_cast %311 : vector<1x16x128xf32> to vector<16x128xf32>
    %c0_93 = arith.constant 0 : index
    %c0_94 = arith.constant 0 : index
    %313 = vector.load %arg4[%c0_93, %c0_94] : memref<32x128xf32, #tpu.memory_space<vmem>>, vector<32x128xf32>
    %cst_95 = arith.constant dense<0.000000e+00> : vector<16x128xf32>
    %314 = tpu.matmul %282, %313, %cst_95 {dimension_numbers = #tpu.dot_dimension_numbers<[1], [0], [0], [1], [0, 0, 1, 1], [], []>} : vector<16x32xf32>, vector<32x128xf32>, vector<16x128xf32> -> vector<16x128xf32>
    %315 = arith.addf %312, %314 : vector<16x128xf32>
    %316 = arith.negf %315 : vector<16x128xf32>
    %317 = math.exp %316 : vector<16x128xf32>
    %cst_96 = arith.constant 1.000000e+00 : f32
    %318 = vector.broadcast %cst_96 : f32 to vector<16x128xf32>
    %319 = arith.addf %318, %317 : vector<16x128xf32>
    %320 = arith.divf %318, %319 : vector<16x128xf32>
    %321 = math.tanh %315 : vector<16x128xf32>
    %322 = vector.extract_strided_slice %320 {offsets = [0, 0], sizes = [16, 32], strides = [1, 1]} : vector<16x128xf32> to vector<16x32xf32>
    %323 = vector.extract_strided_slice %320 {offsets = [0, 32], sizes = [16, 32], strides = [1, 1]} : vector<16x128xf32> to vector<16x32xf32>
    %324 = vector.extract_strided_slice %321 {offsets = [0, 64], sizes = [16, 32], strides = [1, 1]} : vector<16x128xf32> to vector<16x32xf32>
    %325 = vector.extract_strided_slice %320 {offsets = [0, 96], sizes = [16, 32], strides = [1, 1]} : vector<16x128xf32> to vector<16x32xf32>
    %326 = arith.mulf %323, %283 : vector<16x32xf32>
    %327 = arith.mulf %322, %324 : vector<16x32xf32>
    %328 = arith.addf %326, %327 : vector<16x32xf32>
    %329 = math.tanh %328 : vector<16x32xf32>
    %330 = arith.mulf %325, %329 : vector<16x32xf32>
    %331 = arith.select %309, %330, %282 : vector<16x32xi1>, vector<16x32xf32>
    %332 = arith.select %309, %328, %283 : vector<16x32xi1>, vector<16x32xf32>
    %333 = tpu.concatenate %331, %305 in 1 : vector<16x32xf32>, vector<16x32xf32> -> vector<16x64xf32>
    %c0_97 = arith.constant 0 : index
    %c0_98 = arith.constant 0 : index
    %334 = vector.load %arg6[%c0_97, %c0_98] : memref<64x128xf32, #tpu.memory_space<vmem>>, vector<64x128xf32>
    %cst_99 = arith.constant dense<0.000000e+00> : vector<16x128xf32>
    %335 = tpu.matmul %333, %334, %cst_99 {dimension_numbers = #tpu.dot_dimension_numbers<[1], [0], [0], [1], [0, 0, 1, 1], [], []>} : vector<16x64xf32>, vector<64x128xf32>, vector<16x128xf32> -> vector<16x128xf32>
    %c0_100 = arith.constant 0 : index
    %c0_101 = arith.constant 0 : index
    %336 = vector.load %arg7[%c0_100, %c0_101] : memref<1x128xf32, #tpu.memory_space<vmem>>, vector<1x128xf32>
    %337 = vector.broadcast %336 : vector<1x128xf32> to vector<16x128xf32>
    %338 = arith.addf %335, %337 : vector<16x128xf32>
    %339 = arith.negf %338 : vector<16x128xf32>
    %340 = math.exp %339 : vector<16x128xf32>
    %cst_102 = arith.constant 1.000000e+00 : f32
    %341 = vector.broadcast %cst_102 : f32 to vector<16x128xf32>
    %342 = arith.addf %341, %340 : vector<16x128xf32>
    %343 = arith.divf %341, %342 : vector<16x128xf32>
    %344 = math.tanh %338 : vector<16x128xf32>
    %345 = vector.extract_strided_slice %343 {offsets = [0, 0], sizes = [16, 32], strides = [1, 1]} : vector<16x128xf32> to vector<16x32xf32>
    %346 = vector.extract_strided_slice %343 {offsets = [0, 32], sizes = [16, 32], strides = [1, 1]} : vector<16x128xf32> to vector<16x32xf32>
    %347 = vector.extract_strided_slice %344 {offsets = [0, 64], sizes = [16, 32], strides = [1, 1]} : vector<16x128xf32> to vector<16x32xf32>
    %348 = vector.extract_strided_slice %343 {offsets = [0, 96], sizes = [16, 32], strides = [1, 1]} : vector<16x128xf32> to vector<16x32xf32>
    %349 = arith.mulf %346, %306 : vector<16x32xf32>
    %350 = arith.mulf %345, %347 : vector<16x32xf32>
    %351 = arith.addf %349, %350 : vector<16x32xf32>
    %352 = math.tanh %351 : vector<16x32xf32>
    %353 = arith.mulf %348, %352 : vector<16x32xf32>
    %354 = arith.select %309, %353, %305 : vector<16x32xi1>, vector<16x32xf32>
    %355 = arith.select %309, %351, %306 : vector<16x32xi1>, vector<16x32xf32>
    %c7_i32 = arith.constant 7 : i32
    %c0_i32_103 = arith.constant 0 : i32
    %356 = arith.addi %c0_i32_103, %c7_i32 : i32
    %357 = vector.broadcast %356 : i32 to vector<16x32xi32>
    %358 = arith.cmpi sgt, %2, %357 : vector<16x32xi32>
    %359 = arith.index_cast %c7_i32 : i32 to index
    %c0_104 = arith.constant 0 : index
    %c0_105 = arith.constant 0 : index
    %360 = vector.load %arg11[%359, %c0_104, %c0_105] : memref<8x16x128xf32, #tpu.memory_space<vmem>>, vector<1x16x128xf32>
    %361 = vector.shape_cast %360 : vector<1x16x128xf32> to vector<16x128xf32>
    %c0_106 = arith.constant 0 : index
    %c0_107 = arith.constant 0 : index
    %362 = vector.load %arg4[%c0_106, %c0_107] : memref<32x128xf32, #tpu.memory_space<vmem>>, vector<32x128xf32>
    %cst_108 = arith.constant dense<0.000000e+00> : vector<16x128xf32>
    %363 = tpu.matmul %331, %362, %cst_108 {dimension_numbers = #tpu.dot_dimension_numbers<[1], [0], [0], [1], [0, 0, 1, 1], [], []>} : vector<16x32xf32>, vector<32x128xf32>, vector<16x128xf32> -> vector<16x128xf32>
    %364 = arith.addf %361, %363 : vector<16x128xf32>
    %365 = arith.negf %364 : vector<16x128xf32>
    %366 = math.exp %365 : vector<16x128xf32>
    %cst_109 = arith.constant 1.000000e+00 : f32
    %367 = vector.broadcast %cst_109 : f32 to vector<16x128xf32>
    %368 = arith.addf %367, %366 : vector<16x128xf32>
    %369 = arith.divf %367, %368 : vector<16x128xf32>
    %370 = math.tanh %364 : vector<16x128xf32>
    %371 = vector.extract_strided_slice %369 {offsets = [0, 0], sizes = [16, 32], strides = [1, 1]} : vector<16x128xf32> to vector<16x32xf32>
    %372 = vector.extract_strided_slice %369 {offsets = [0, 32], sizes = [16, 32], strides = [1, 1]} : vector<16x128xf32> to vector<16x32xf32>
    %373 = vector.extract_strided_slice %370 {offsets = [0, 64], sizes = [16, 32], strides = [1, 1]} : vector<16x128xf32> to vector<16x32xf32>
    %374 = vector.extract_strided_slice %369 {offsets = [0, 96], sizes = [16, 32], strides = [1, 1]} : vector<16x128xf32> to vector<16x32xf32>
    %375 = arith.mulf %372, %332 : vector<16x32xf32>
    %376 = arith.mulf %371, %373 : vector<16x32xf32>
    %377 = arith.addf %375, %376 : vector<16x32xf32>
    %378 = math.tanh %377 : vector<16x32xf32>
    %379 = arith.mulf %374, %378 : vector<16x32xf32>
    %380 = arith.select %358, %379, %331 : vector<16x32xi1>, vector<16x32xf32>
    %381 = arith.select %358, %377, %332 : vector<16x32xi1>, vector<16x32xf32>
    %382 = tpu.concatenate %380, %354 in 1 : vector<16x32xf32>, vector<16x32xf32> -> vector<16x64xf32>
    %c0_110 = arith.constant 0 : index
    %c0_111 = arith.constant 0 : index
    %383 = vector.load %arg6[%c0_110, %c0_111] : memref<64x128xf32, #tpu.memory_space<vmem>>, vector<64x128xf32>
    %cst_112 = arith.constant dense<0.000000e+00> : vector<16x128xf32>
    %384 = tpu.matmul %382, %383, %cst_112 {dimension_numbers = #tpu.dot_dimension_numbers<[1], [0], [0], [1], [0, 0, 1, 1], [], []>} : vector<16x64xf32>, vector<64x128xf32>, vector<16x128xf32> -> vector<16x128xf32>
    %c0_113 = arith.constant 0 : index
    %c0_114 = arith.constant 0 : index
    %385 = vector.load %arg7[%c0_113, %c0_114] : memref<1x128xf32, #tpu.memory_space<vmem>>, vector<1x128xf32>
    %386 = vector.broadcast %385 : vector<1x128xf32> to vector<16x128xf32>
    %387 = arith.addf %384, %386 : vector<16x128xf32>
    %388 = arith.negf %387 : vector<16x128xf32>
    %389 = math.exp %388 : vector<16x128xf32>
    %cst_115 = arith.constant 1.000000e+00 : f32
    %390 = vector.broadcast %cst_115 : f32 to vector<16x128xf32>
    %391 = arith.addf %390, %389 : vector<16x128xf32>
    %392 = arith.divf %390, %391 : vector<16x128xf32>
    %393 = math.tanh %387 : vector<16x128xf32>
    %394 = vector.extract_strided_slice %392 {offsets = [0, 0], sizes = [16, 32], strides = [1, 1]} : vector<16x128xf32> to vector<16x32xf32>
    %395 = vector.extract_strided_slice %392 {offsets = [0, 32], sizes = [16, 32], strides = [1, 1]} : vector<16x128xf32> to vector<16x32xf32>
    %396 = vector.extract_strided_slice %393 {offsets = [0, 64], sizes = [16, 32], strides = [1, 1]} : vector<16x128xf32> to vector<16x32xf32>
    %397 = vector.extract_strided_slice %392 {offsets = [0, 96], sizes = [16, 32], strides = [1, 1]} : vector<16x128xf32> to vector<16x32xf32>
    %398 = arith.mulf %395, %355 : vector<16x32xf32>
    %399 = arith.mulf %394, %396 : vector<16x32xf32>
    %400 = arith.addf %398, %399 : vector<16x32xf32>
    %401 = math.tanh %400 : vector<16x32xf32>
    %402 = arith.mulf %397, %401 : vector<16x32xf32>
    %403 = arith.select %358, %402, %354 : vector<16x32xi1>, vector<16x32xf32>
    %404 = arith.select %358, %400, %355 : vector<16x32xi1>, vector<16x32xf32>
    %c8_i32 = arith.constant 8 : i32
    %c0_116 = arith.constant 0 : index
    %c0_117 = arith.constant 0 : index
    %405 = vector.load %arg8[%c0_116, %c0_117] : memref<32x128xf32, #tpu.memory_space<vmem>>, vector<32x128xf32>
    %cst_118 = arith.constant dense<0.000000e+00> : vector<16x128xf32>
    %406 = tpu.matmul %403, %405, %cst_118 {dimension_numbers = #tpu.dot_dimension_numbers<[1], [0], [0], [1], [0, 0, 1, 1], [], []>} : vector<16x32xf32>, vector<32x128xf32>, vector<16x128xf32> -> vector<16x128xf32>
    %c0_119 = arith.constant 0 : index
    %c0_120 = arith.constant 0 : index
    %407 = vector.load %arg9[%c0_119, %c0_120] : memref<1x128xf32, #tpu.memory_space<vmem>>, vector<1x128xf32>
    %408 = vector.broadcast %407 : vector<1x128xf32> to vector<16x128xf32>
    %409 = arith.addf %406, %408 : vector<16x128xf32>
    %cst_121 = arith.constant dense<0xFF800000> : vector<16xf32>
    %410 = vector.multi_reduction <maximumf>, %409, %cst_121 [1] : vector<16x128xf32> to vector<16xf32>
    %411 = vector.shape_cast %410 : vector<16xf32> to vector<16x1xf32>
    %412 = vector.broadcast %411 : vector<16x1xf32> to vector<16x128xf32>
    %413 = arith.subf %409, %412 : vector<16x128xf32>
    %414 = math.exp %413 : vector<16x128xf32>
    %cst_122 = arith.constant dense<0.000000e+00> : vector<16xf32>
    %415 = vector.multi_reduction <add>, %414, %cst_122 [1] : vector<16x128xf32> to vector<16xf32>
    %416 = vector.shape_cast %415 : vector<16xf32> to vector<16x1xf32>
    %417 = math.log %416 : vector<16x1xf32>
    %418 = arith.addf %411, %417 : vector<16x1xf32>
    %419 = vector.broadcast %418 : vector<16x1xf32> to vector<16x128xf32>
    %420 = arith.subf %409, %419 : vector<16x128xf32>
    %c0_123 = arith.constant 0 : index
    %c0_124 = arith.constant 0 : index
    %421 = vector.load %arg10[%c0_123, %c0_124] : memref<16x128xf32, #tpu.memory_space<vmem>>, vector<16x128xf32>
    tpu.vector_store %arg10[%c0_123, %c0_124], %420 {strides = array<i32>} : memref<16x128xf32, #tpu.memory_space<vmem>>, vector<16x128xf32>,
    return
  }
  func.func @transform_0(%arg0: i32) -> (i32, i32, i32) {
    %c0_i32 = arith.constant 0 : i32
    %c0_i32_0 = arith.constant 0 : i32
    %c0_i32_1 = arith.constant 0 : i32
    return %c0_i32, %arg0, %c0_i32_0 : i32, i32, i32
  }
  func.func @transform_1(%arg0: i32) -> (i32, i32) {
    %c0_i32 = arith.constant 0 : i32
    %c0_i32_0 = arith.constant 0 : i32
    return %arg0, %c0_i32 : i32, i32
  }
  func.func @transform_2(%arg0: i32) -> (i32, i32) {
    %c0_i32 = arith.constant 0 : i32
    %c0_i32_0 = arith.constant 0 : i32
    %c0_i32_1 = arith.constant 0 : i32
    return %c0_i32, %c0_i32_0 : i32, i32
  }
  func.func @transform_3(%arg0: i32) -> (i32, i32) {
    %c0_i32 = arith.constant 0 : i32
    %c0_i32_0 = arith.constant 0 : i32
    %c0_i32_1 = arith.constant 0 : i32
    return %c0_i32, %c0_i32_0 : i32, i32
  }
  func.func @transform_4(%arg0: i32) -> (i32, i32) {
    %c0_i32 = arith.constant 0 : i32
    %c0_i32_0 = arith.constant 0 : i32
    %c0_i32_1 = arith.constant 0 : i32
    return %c0_i32, %c0_i32_0 : i32, i32
  }
  func.func @transform_5(%arg0: i32) -> (i32, i32) {
    %c0_i32 = arith.constant 0 : i32
    %c0_i32_0 = arith.constant 0 : i32
    %c0_i32_1 = arith.constant 0 : i32
    return %c0_i32, %c0_i32_0 : i32, i32
  }
  func.func @transform_6(%arg0: i32) -> (i32, i32) {
    %c0_i32 = arith.constant 0 : i32
    %c0_i32_0 = arith.constant 0 : i32
    %c0_i32_1 = arith.constant 0 : i32
    return %c0_i32, %c0_i32_0 : i32, i32
  }
  func.func @transform_7(%arg0: i32) -> (i32, i32) {
    %c0_i32 = arith.constant 0 : i32
    %c0_i32_0 = arith.constant 0 : i32
    %c0_i32_1 = arith.constant 0 : i32
    return %c0_i32, %c0_i32_0 : i32, i32
  }
  func.func @transform_8(%arg0: i32) -> (i32, i32) {
    %c0_i32 = arith.constant 0 : i32
    %c0_i32_0 = arith.constant 0 : i32
    %c0_i32_1 = arith.constant 0 : i32
    return %c0_i32, %c0_i32_0 : i32, i32
  }
  func.func @transform_9(%arg0: i32) -> (i32, i32) {
    %c0_i32 = arith.constant 0 : i32
    %c0_i32_0 = arith.constant 0 : i32
    return %arg0, %c0_i32 : i32, i32
  }
}

</mosaic_0001>

<bundles_post_ra>
// kernel: custom_lstm_forward.1
= control target key start
LH: loop header
LB: loop body
LE: loop exit
PB: predicated region body
PF: predicated region fallthrough
CT: control target
= control target key end

     0   :  { %v3494_v1 = vmov 0.0   ;;  %vm120_vm0 = vcmask 261120   ;;  %v3495_v9 = vmov 0   ;;  %s3496_s26 = smov 64   ;;  %s3497_s29 = smov 32   ;;  %vm423_vm3 = vcmask 523264   ;;  %s4659_s2 = inlined_call_operand.vmem [shape: bf16[32,128], index: 2, kind: input, shape index: {}]   ;;  %s4660_s3 = inlined_call_operand.vmem [shape: f32[32,128], index: 3, kind: input, shape index: {}]   ;;  %s4661_s0 = inlined_call_operand.vmem [shape: bf16[8,16,32], index: 0, kind: input, shape index: {}]   ;;  %s4662_s4 = inlined_call_operand.vmem [shape: f32[1,128], index: 4, kind: input, shape index: {}]   ;;  %s4663_s1 = inlined_call_operand.vmem [shape: s32[16,1], index: 1, kind: input, shape index: {}]   ;;  %s4664_s5 = inlined_call_operand.vmem [shape: f32[64,128], index: 5, kind: input, shape index: {}]   ;;  %s4665_s6 = inlined_call_operand.vmem [shape: f32[1,128], index: 6, kind: input, shape index: {}]   ;;  %s4666_s7 = inlined_call_operand.vmem [shape: f32[32,128], index: 7, kind: input, shape index: {}]   ;;  %s4667_s8 = inlined_call_operand.vmem [shape: f32[1,128], index: 8, kind: input, shape index: {}]   ;;  %s4668_s9 = inlined_call_operand.vmem [shape: f32[16,128], index: 9, kind: output, shape index: {}]  }
   0x1   :  { %v3206_v0 = vld [vmem:[%s4659_s2 + $0x8] sm:$0xff]   ;;  %2957 = vmatprep.mubr.f32.mxu1 %v3494_v1  ;;  %v3554_v2 = vld [vmem:[%s4660_s3 + $0x18] sm:$0xff]  ;;  %v3559_v3 = vld [vmem:[%s4660_s3 + $0x10] sm:$0xff]  ;;  %3204 = vset.pattern.permute.xlu0 %v3495_v9 }
   0x2   :  { %2929 = vmatprep.subr.bf16.mxu0 %v3206_v0  ;;  %2949 = vmatprep.subr.mxu1 %v3554_v2  ;;  %v3207_v4 = vld [vmem:[%s4659_s2] sm:$0xff]   ;;  %v3568_v5 = vld [vmem:[%s4660_s3 + $0x8] sm:$0xff]  ;;  %v3628_v43 = vld [vmem:[%s4664_s5 + $0x38] sm:$0xff] }
   0x3   :  { %2930 = vmatpush3.bf16.msra.mxu0 %v3206_v0  ;;  %2950 = vmatpush3.msra.mxu1 %v3554_v2  ;;  %v3574_v6 = vld [vmem:[%s4660_s3] sm:$0xff]  ;;  %v3209_v8 = vld [vmem:[%s4661_s0 + $0x8] sm:$0xff]   ;;  %v3633_v44 = vld [vmem:[%s4664_s5 + $0x30] sm:$0xff] }
   0x4   :  { %2951 = vmatprep.subr.mxu1 %v3559_v3  ;;  %2931 = vmatprep.subr.bf16.mxu0 %v3207_v4  ;;  %v3208_v7 = vld [vmem:[%s4661_s0] sm:$0xff]   ;;  %v34_v36 = vld [vmem:[%s4663_s1 + $0x8] sm:$0xff]  ;;  %v3659_v48 = vld [vmem:[%s4664_s5 + $0x18] sm:$0xff] }
   0x5   :  { %2952 = vmatpush3.msra.mxu1 %v3559_v3  ;;  %2933 = vmatprep.mubr.msk.bf16.mxu0 %vm120_vm0, %v3208_v7  ;;  %v3595_v12 = vld [vmem:[%s4662_s4] ss:$0 sm:$0xff]  ;;  %v3641_v45 = vld [vmem:[%s4664_s5 + $0x28] sm:$0xff]  ;;  %v3668_v50 = vld [vmem:[%s4664_s5 + $0x10] sm:$0xff] }
   0x6   :  { %2953 = vmatprep.subr.mxu1 %v3568_v5  ;;  %3205 = vset.pattern.permute.xlu1 %v3495_v9  ;;  %v33_v23 = vld [vmem:[%s4663_s1] sm:$0xff]  ;;  %v3684_v51 = vld [vmem:[%s4664_s5 + $0x8] sm:$0xff] }
   0x7   :  { %2932 = vmatpush3.bf16.msra.mxu0 %v3207_v4  ;;  %2954 = vmatpush3.msra.mxu1 %v3568_v5  ;;  %v3650_v47 = vld [vmem:[%s4664_s5 + $0x20] sm:$0xff] }
   0x8   :  { %2955 = vmatprep.subr.mxu1 %v3574_v6  ;;  %2990 = vmatprep.subr.mxu0 %v3628_v43  ;;  %v3692_v52 = vld [vmem:[%s4664_s5] sm:$0xff] }
   0x9   :  { %2956 = vmatpush3.msra.mxu1 %v3574_v6  ;;  %v3746_v4 = vld [vmem:[%s4665_s6] ss:$0 sm:$0xff] }
   0xa   :  { %2934 = vmatmul.mubr.msk.bf16.vlgmr.msra.gmra.mxu0 %vm120_vm0, %v3209_v8  ;;  %2958 = vmatmul.mubr.f32.vlgmr.msra.gmra.mxu1 %v3494_v1 }
   0xb   :  { %2960 = vmatprep.subr.mxu1 %v3628_v43  ;;  %2991 = vmatpush3.msra.mxu0 %v3628_v43 }
   0xc   :  { %2961 = vmatpush3.msra.mxu1 %v3628_v43  ;;  %2992 = vmatprep.subr.mxu0 %v3633_v44 }
   0xd   :  { %2962 = vmatprep.subr.mxu1 %v3633_v44  ;;  %2993 = vmatpush3.msra.mxu0 %v3633_v44 }
   0xe   :  { %2963 = vmatpush3.msra.mxu1 %v3633_v44  ;;  %2994 = vmatprep.subr.mxu0 %v3641_v45 }
   0xf   :  { %2964 = vmatprep.subr.mxu1 %v3641_v45  ;;  %2995 = vmatpush3.msra.mxu0 %v3641_v45 }
  0x10   :  { %2965 = vmatpush3.msra.mxu1 %v3641_v45  ;;  %2996 = vmatprep.subr.mxu0 %v3650_v47 }
  0x11   :  { %2966 = vmatprep.subr.mxu1 %v3650_v47  ;;  %2997 = vmatpush3.msra.mxu0 %v3650_v47 }
  0x12   :  { %2967 = vmatpush3.msra.mxu1 %v3650_v47  ;;  %2998 = vmatprep.subr.mxu0 %v3659_v48 }
  0x13   :  { %2968 = vmatprep.subr.mxu1 %v3659_v48  ;;  %2999 = vmatpush3.msra.mxu0 %v3659_v48 }
  0x14   :  { %2969 = vmatpush3.msra.mxu1 %v3659_v48  ;;  %3000 = vmatprep.subr.mxu0 %v3668_v50 }
  0x15   :  { %2970 = vmatprep.subr.mxu1 %v3668_v50  ;;  %3001 = vmatpush3.msra.mxu0 %v3668_v50 }
  0x16   :  { %2971 = vmatpush3.msra.mxu1 %v3668_v50  ;;  %3002 = vmatprep.subr.mxu0 %v3684_v51 }
  0x17   :  { %2972 = vmatprep.subr.mxu1 %v3684_v51  ;;  %3003 = vmatpush3.msra.mxu0 %v3684_v51 }
  0x18   :  { %2973 = vmatpush3.msra.mxu1 %v3684_v51  ;;  %3004 = vmatprep.subr.mxu0 %v3692_v52 }
  0x19   :  { %2974 = vmatprep.subr.mxu1 %v3692_v52  ;;  %3005 = vmatpush3.msra.mxu0 %v3692_v52 }
  0x1a   :  { %2975 = vmatpush3.msra.mxu1 %v3692_v52  ;;  %3020 = vmatprep.subr.mxu0 %v3628_v43 }
  0x1b   :  { %2979 = vmatprep.subr.mxu1 %v3554_v2 }
  0xca   :  { %v3590_v10 = vpop.f32.mrf.mxu0  ;;  %v2959_v11 = vpop.f32.mrf.mxu1 }
  0xcc   :  { %v179_v13 = vpop.f32.mrf.mxu0  ;;  %v335_v15 = vpop.f32.mrf.mxu1 }
  0xcd   :  { %v180_v14 = vadd.f32 %v3595_v12, %v179_v13  ;;  %v188_v13 = vadd.f32 %v3590_v10, %v3595_v12 }
  0xce   :  { %v3598_v16 = vpop.f32.mrf.mxu0 }
  0xcf   :  { %v344_v17 = vadd.f32 %v335_v15, %v180_v14 }
  0xd0   :  { %v182_v18 = vpop.f32.mrf.mxu0 }
  0xd1   :  { %3216 = vtanh.f32 %v344_v17  ;;  %v183_v19 = vadd.f32 %v3595_v12, %v182_v18  ;;  %v2719_v24 = vmul.f32 -1.442695, %v344_v17  ;;  %v191_v17 = vadd.f32 %v3598_v16, %v3595_v12 }
  0xd3   :  { %v345_v20 = vadd.f32 %v2959_v11, %v183_v19 }
  0xd5   :  { %3218 = vtanh.f32 %v345_v20  ;;  %v2720_v25 = vmul.f32 -1.442695, %v345_v20 }
  0xd6   :  { %3220 = vpow2.f32 %v2719_v24 }
  0xd7   :  { %3222 = vpow2.f32 %v2720_v25 }
  0xde   :  { %v3217_v21 = vpop.eup %3216 }
  0xdf   :  { %364 = vrot.lane.b32.xlu0 %v3217_v21, %s3496_s26 }
  0xe2   :  { %v3219_v22 = vpop.eup %3218 }
  0xe3   :  { %366 = vrot.lane.b32.xlu0 %v3219_v22, %s3496_s26  ;;  %v3221_v26 = vpop.eup %3220 }
  0xe4   :  { %v352_v27 = vadd.f32 1.0, %v3221_v26  ;;  %v3223_v28 = vpop.eup %3222 }
  0xe5   :  { %v353_v29 = vadd.f32 1.0, %v3223_v28 }
  0xe6   :  { %3224 = vrcp.f32 %v352_v27 }
  0xe7   :  { %36 = vperm.xlu0 %3204, %v33_v23   ;;  %3226 = vrcp.f32 %v353_v29 }
  0xf3   :  { %v3606_v30 = vpop.eup %3224 }
  0xf4   :  { %v3610_v33 = vpop.eup %3226  ;;  %v360_v37 = vmul.f32 0.0, %v3606_v30 }
  0xf5   :  { %v361_v40 = vmul.f32 0.0, %v3610_v33 }
 0x151   :  { %v365_v31 = vpop.permute.xlu0 %364 }
 0x152   :  { %v370_v32 = vmul.f32 %v3606_v30, %v365_v31 }
 0x154   :  { %374 = vrot.lane.b32.xlu1 %v370_v32, %s3497_s29 }
 0x155   :  { %v367_v34 = vpop.permute.xlu0 %366 }
 0x156   :  { %v371_v35 = vmul.f32 %v3610_v33, %v367_v34 }
 0x158   :  { %376 = vrot.lane.b32.xlu1 %v371_v35, %s3497_s29 }
 0x15c   :  { %39 = vperm.xlu1 %3205, %v34_v36  }
 0x162   :  { %v3703_v54 = vpop.permute.xlu0 %36 }
 0x163   :  { %vm258_vm1 = vcmp.gt.s32.totalorder %v3703_v54, 0  ;;  %vm557_vm4 = vcmp.gt.s32.totalorder %v3703_v54, 1  ;;  %vm846_vm6 = vcmp.gt.s32.totalorder %v3703_v54, 2  ;;  %vm1135_vm8 = vcmp.gt.s32.totalorder %v3703_v54, 3 }
 0x164   :  { %vm1424_vm10 = vcmp.gt.s32.totalorder %v3703_v54, 4  ;;  %vm1713_vm12 = vcmp.gt.s32.totalorder %v3703_v54, 5  ;;  %vm2002_vm14 = vcmp.gt.s32.totalorder %v3703_v54, 6 }
 0x1c6   :  { %v375_v38 = vpop.permute.xlu1 %374 }
 0x1c7   :  { %v3618_v39 = vadd.f32 %v375_v38, %v360_v37 }
 0x1c9   :  { %3228 = vtanh.f32 %v3618_v39 }
 0x1ca   :  { %v377_v41 = vpop.permute.xlu1 %376 }
 0x1cb   :  { %v3622_v42 = vadd.f32 %v377_v41, %v361_v40 }
 0x1cd   :  { %3230 = vtanh.f32 %v3622_v42 }
 0x1d6   :  { %v3229_v46 = vpop.eup %3228 }
 0x1d7   :  { %386 = vrot.lane.b32.xlu1 %v3229_v46, %s3496_s26  ;;  %v3701_v53 = vpop.permute.xlu1 %39 }
 0x1d8   :  { %vm259_vm2 = vcmp.gt.s32.totalorder %v3701_v53, 0  ;;  %vm558_vm5 = vcmp.gt.s32.totalorder %v3701_v53, 1  ;;  %vm847_vm7 = vcmp.gt.s32.totalorder %v3701_v53, 2  ;;  %vm1136_vm9 = vcmp.gt.s32.totalorder %v3701_v53, 3 }
 0x1d9   :  { %vm1425_vm11 = vcmp.gt.s32.totalorder %v3701_v53, 4  ;;  %vm1714_vm13 = vcmp.gt.s32.totalorder %v3701_v53, 5  ;;  %vm2003_vm15 = vcmp.gt.s32.totalorder %v3701_v53, 6 }
 0x1da   :  { %v3231_v49 = vpop.eup %3230 }
 0x1db   :  { %388 = vrot.lane.b32.xlu0 %v3231_v49, %s3496_s26 }
 0x249   :  { %v387_v55 = vpop.permute.xlu1 %386 }
 0x24a   :  { %v392_v56 = vmul.f32 %v3606_v30, %v387_v55 }
 0x24c   :  { %v3709_v57 = vsel %vm258_vm1, %v392_v56, 0.0 }
 0x24d   :  { %v389_v58 = vpop.permute.xlu0 %388  ;;  %400 = vrot.lane.b32.xlu1 %v3709_v57, %s3497_s29 }
 0x24e   :  { %v393_v59 = vmul.f32 %v3610_v33, %v389_v58 }
 0x250   :  { %v3717_v60 = vsel %vm259_vm2, %v393_v59, 0.0 }
 0x251   :  { %402 = vrot.lane.b32.xlu0 %v3717_v60, %s3497_s29 }
 0x2bf   :  { %v401_v61 = vpop.permute.xlu1 %400 }
 0x2c0   :  { %v406_v62 = vsel %vm120_vm0, %v401_v61, 0.0 }
 0x2c1   :  { %2976 = vmatprep.mubr.msk.f32.mxu1 %vm423_vm3, %v406_v62 }
 0x2c3   :  { %v403_v63 = vpop.permute.xlu0 %402 }
 0x2c4   :  { %v407_v0 = vsel %vm120_vm0, %v403_v63, 0.0 }
 0x2c5   :  { %2977 = vmatmul.mubr.msk.f32.vlgmr.msra.gmra.mxu1 %vm423_vm3, %v407_v0 }
 0x2c6   :  { %2980 = vmatpush3.msra.mxu1 %v3554_v2  ;;  %2987 = vmatprep.mubr.msk.f32.mxu1 %vm120_vm0, %v401_v61 }
 0x2c7   :  { %2981 = vmatprep.subr.mxu1 %v3559_v3 }
 0x2c8   :  { %2982 = vmatpush3.msra.mxu1 %v3559_v3 }
 0x2c9   :  { %2983 = vmatprep.subr.mxu1 %v3568_v5 }
 0x2ca   :  { %2984 = vmatpush3.msra.mxu1 %v3568_v5 }
 0x2cb   :  { %2985 = vmatprep.subr.mxu1 %v3574_v6 }
 0x2cc   :  { %2986 = vmatpush3.msra.mxu1 %v3574_v6 }
 0x2cd   :  { %2988 = vmatmul.mubr.msk.f32.vlgmr.msra.gmra.mxu1 %vm120_vm0, %v403_v63  ;;  %3009 = vmatprep.subr.mxu1 %v3554_v2 }
 0x2ce   :  { %3010 = vmatpush3.msra.mxu1 %v3554_v2 }
 0x2cf   :  { %3011 = vmatprep.subr.mxu1 %v3559_v3 }
 0x2d0   :  { %3012 = vmatpush3.msra.mxu1 %v3559_v3 }
 0x2d1   :  { %3013 = vmatprep.subr.mxu1 %v3568_v5 }
 0x2d2   :  { %3014 = vmatpush3.msra.mxu1 %v3568_v5 }
 0x2d3   :  { %3015 = vmatprep.subr.mxu1 %v3574_v6 }
 0x2d4   :  { %3016 = vmatpush3.msra.mxu1 %v3574_v6 }
 0x2d5   :  { %3039 = vmatprep.subr.mxu1 %v3554_v2 }
 0x385   :  { %v2978_v1 = vpop.f32.mrf.mxu1 }
 0x386   :  { %v502_v9 = vadd.f32 %v2978_v1, %v3746_v4  ;;  %v3770_v1 = vsel %vm258_vm1, %v3618_v39, 0.0 }
 0x387   :  { %v496_v7 = vpop.f32.mrf.mxu1 }
 0x388   :  { %v497_v8 = vadd.f32 %v3746_v4, %v496_v7  ;;  %v2725_v23 = vmul.f32 -1.442695, %v502_v9 }
 0x38a   :  { %3232 = vtanh.f32 %v497_v8  ;;  %v2724_v10 = vmul.f32 -1.442695, %v497_v8 }
 0x38b   :  { %3234 = vtanh.f32 %v502_v9 }
 0x38d   :  { %v2989_v11 = vpop.f32.mrf.mxu1 }
 0x38e   :  { %v642_v18 = vadd.f32 %v2989_v11, %v191_v17  ;;  %v3779_v11 = vsel %vm259_vm2, %v3622_v42, 0.0  ;;  %v3210_v17 = vld [vmem:[%s4661_s0 + $0x10] sm:$0xff]   ;;  %v3211_v42 = vld [vmem:[%s4661_s0 + $0x18] sm:$0xff]  }
 0x38f   :  { %v632_v14 = vpop.f32.mrf.mxu1  ;;  %2937 = vmatprep.mubr.msk.bf16.mxu0 %vm120_vm0, %v3210_v17 }
 0x390   :  { %v641_v15 = vadd.f32 %v632_v14, %v188_v13  ;;  %v2729_v24 = vmul.f32 -1.442695, %v642_v18  ;;  %2938 = vmatmul.mubr.msk.bf16.gmra.mxu0 %vm120_vm0, %v3211_v42 }
 0x392   :  { %3236 = vtanh.f32 %v641_v15  ;;  %v2728_v16 = vmul.f32 -1.442695, %v641_v15 }
 0x393   :  { %3238 = vtanh.f32 %v642_v18  ;;  %v3212_v18 = vld [vmem:[%s4661_s0 + $0x20] sm:$0xff]  }
 0x394   :  { %3240 = vpow2.f32 %v2724_v10  ;;  %2941 = vmatprep.mubr.msk.bf16.mxu0 %vm120_vm0, %v3212_v18 }
 0x395   :  { %3242 = vpow2.f32 %v2725_v23  ;;  %v3215_v23 = vld [vmem:[%s4661_s0 + $0x38] sm:$0xff]  }
 0x396   :  { %3244 = vpow2.f32 %v2728_v16 }
 0x397   :  { %v3233_v19 = vpop.eup %3232  ;;  %3246 = vpow2.f32 %v2729_v24 }
 0x398   :  { %523 = vrot.lane.b32.xlu1 %v3233_v19, %s3496_s26  ;;  %v3235_v20 = vpop.eup %3234 }
 0x39c   :  { %525 = vrot.lane.b32.xlu1 %v3235_v20, %s3496_s26 }
 0x39f   :  { %v3237_v21 = vpop.eup %3236 }
 0x3a0   :  { %661 = vrot.lane.b32.xlu0 %v3237_v21, %s3496_s26  ;;  %v3239_v22 = vpop.eup %3238  ;;  %v3213_v21 = vld [vmem:[%s4661_s0 + $0x28] sm:$0xff]  }
 0x3a1   :  { %v3241_v25 = vpop.eup %3240  ;;  %2942 = vmatmul.mubr.msk.bf16.gmra.mxu0 %vm120_vm0, %v3213_v21 }
 0x3a2   :  { %v511_v26 = vadd.f32 1.0, %v3241_v25  ;;  %v3243_v27 = vpop.eup %3242 }
 0x3a3   :  { %v512_v28 = vadd.f32 1.0, %v3243_v27  ;;  %v3245_v29 = vpop.eup %3244 }
 0x3a4   :  { %663 = vrot.lane.b32.xlu0 %v3239_v22, %s3496_s26  ;;  %3248 = vrcp.f32 %v511_v26  ;;  %v649_v30 = vadd.f32 1.0, %v3245_v29  ;;  %v3247_v31 = vpop.eup %3246  ;;  %v3214_v22 = vld [vmem:[%s4661_s0 + $0x30] sm:$0xff]  }
 0x3a5   :  { %3250 = vrcp.f32 %v512_v28  ;;  %v650_v32 = vadd.f32 1.0, %v3247_v31  ;;  %2945 = vmatprep.mubr.msk.bf16.mxu0 %vm120_vm0, %v3214_v22 }
 0x3a6   :  { %3252 = vrcp.f32 %v649_v30 }
 0x3a7   :  { %3254 = vrcp.f32 %v650_v32 }
 0x3a9   :  { %2946 = vmatmul.mubr.msk.bf16.gmra.mxu0 %vm120_vm0, %v3215_v23 }
 0x3b1   :  { %v3249_v33 = vpop.eup %3248 }
 0x3b2   :  { %v3251_v36 = vpop.eup %3250  ;;  %v519_v58 = vmul.f32 0.0, %v3249_v33 }
 0x3b3   :  { %v3253_v40 = vpop.eup %3252  ;;  %v520_v62 = vmul.f32 0.0, %v3251_v36 }
 0x3b4   :  { %v3255_v49 = vpop.eup %3254  ;;  %v657_v7 = vmul.f32 %v3253_v40, %v3770_v1 }
 0x3b5   :  { %v658_v13 = vmul.f32 %v3255_v49, %v3779_v11 }
 0x40a   :  { %v524_v34 = vpop.permute.xlu1 %523 }
 0x40b   :  { %v529_v35 = vmul.f32 %v3249_v33, %v524_v34 }
 0x40d   :  { %533 = vrot.lane.b32.xlu1 %v529_v35, %s3497_s29 }
 0x40e   :  { %v526_v37 = vpop.permute.xlu1 %525 }
 0x40f   :  { %v530_v38 = vmul.f32 %v3251_v36, %v526_v37 }
 0x411   :  { %535 = vrot.lane.b32.xlu1 %v530_v38, %s3497_s29 }
 0x412   :  { %v662_v41 = vpop.permute.xlu0 %661 }
 0x413   :  { %v667_v46 = vmul.f32 %v3253_v40, %v662_v41 }
 0x415   :  { %671 = vrot.lane.b32.xlu0 %v667_v46, %s3497_s29 }
 0x416   :  { %v664_v55 = vpop.permute.xlu0 %663 }
 0x417   :  { %v668_v56 = vmul.f32 %v3255_v49, %v664_v55 }
 0x419   :  { %673 = vrot.lane.b32.xlu0 %v668_v56, %s3497_s29 }
 0x47f   :  { %v534_v59 = vpop.permute.xlu1 %533 }
 0x480   :  { %v3762_v61 = vadd.f32 %v534_v59, %v519_v58 }
 0x482   :  { %3256 = vtanh.f32 %v3762_v61 }
 0x483   :  { %v536_v63 = vpop.permute.xlu1 %535 }
 0x484   :  { %v3765_v0 = vadd.f32 %v536_v63, %v520_v62 }
 0x486   :  { %3258 = vtanh.f32 %v3765_v0 }
 0x487   :  { %v672_v8 = vpop.permute.xlu0 %671 }
 0x488   :  { %v3774_v9 = vadd.f32 %v672_v8, %v657_v7 }
 0x48a   :  { %3260 = vtanh.f32 %v3774_v9 }
 0x48b   :  { %v674_v14 = vpop.permute.xlu0 %673 }
 0x48c   :  { %v3783_v15 = vadd.f32 %v674_v14, %v658_v13 }
 0x48e   :  { %3262 = vtanh.f32 %v3783_v15 }
 0x48f   :  { %v3257_v39 = vpop.eup %3256 }
 0x490   :  { %545 = vrot.lane.b32.xlu1 %v3257_v39, %s3496_s26 }
 0x493   :  { %v3259_v19 = vpop.eup %3258 }
 0x494   :  { %547 = vrot.lane.b32.xlu1 %v3259_v19, %s3496_s26 }
 0x497   :  { %v3261_v20 = vpop.eup %3260 }
 0x498   :  { %683 = vrot.lane.b32.xlu0 %v3261_v20, %s3496_s26 }
 0x49b   :  { %v3263_v10 = vpop.eup %3262 }
 0x49c   :  { %685 = vrot.lane.b32.xlu0 %v3263_v10, %s3496_s26 }
 0x502   :  { %v546_v16 = vpop.permute.xlu1 %545 }
 0x503   :  { %v551_v24 = vmul.f32 %v3249_v33, %v546_v16 }
 0x505   :  { %v3816_v25 = vsel %vm258_vm1, %v551_v24, 0.0 }
 0x506   :  { %705 = vrot.lane.b32.xlu0 %v3816_v25, %s3496_s26  ;;  %v548_v26 = vpop.permute.xlu1 %547 }
 0x507   :  { %v552_v27 = vmul.f32 %v3251_v36, %v548_v26 }
 0x509   :  { %v3822_v28 = vsel %vm259_vm2, %v552_v27, 0.0 }
 0x50a   :  { %v684_v29 = vpop.permute.xlu0 %683  ;;  %707 = vrot.lane.b32.xlu0 %v3822_v28, %s3496_s26 }
 0x50b   :  { %v689_v30 = vmul.f32 %v3253_v40, %v684_v29 }
 0x50d   :  { %v3830_v31 = vsel %vm557_vm4, %v689_v30, %v3709_v57 }
 0x50e   :  { %v686_v32 = vpop.permute.xlu0 %685  ;;  %697 = vrot.lane.b32.xlu1 %v3830_v31, %s3497_s29 }
 0x50f   :  { %v690_v33 = vmul.f32 %v3255_v49, %v686_v32 }
 0x511   :  { %v3838_v34 = vsel %vm558_vm5, %v690_v33, %v3717_v60  ;;  %v3872_v60 = vpop.f32.mrf.mxu0 }
 0x512   :  { %699 = vrot.lane.b32.xlu1 %v3838_v34, %s3497_s29 }
 0x513   :  { %v195_v41 = vpop.f32.mrf.mxu0 }
 0x514   :  { %v196_v39 = vadd.f32 %v3595_v12, %v195_v41 }
 0x515   :  { %v3874_v46 = vpop.f32.mrf.mxu0 }
 0x517   :  { %v198_v49 = vpop.f32.mrf.mxu0 }
 0x518   :  { %v199_v19 = vadd.f32 %v3595_v12, %v198_v49 }
 0x519   :  { %v3876_v55 = vpop.f32.mrf.mxu0 }
 0x51b   :  { %v3878_v56 = vpop.f32.mrf.mxu0 }
 0x51d   :  { %v3880_v58 = vpop.f32.mrf.mxu0 }
 0x51f   :  { %v3882_v59 = vpop.f32.mrf.mxu0 }
 0x521   :  { %v3884_v62 = vpop.f32.mrf.mxu0 }
 0x523   :  { %v3886_v63 = vpop.f32.mrf.mxu0 }
 0x525   :  { %v3888_v7 = vpop.f32.mrf.mxu0 }
 0x527   :  { %v3890_v8 = vpop.f32.mrf.mxu0 }
 0x578   :  { %v706_v35 = vpop.permute.xlu0 %705 }
 0x57c   :  { %v708_v37 = vpop.permute.xlu0 %707 }
 0x580   :  { %v698_v36 = vpop.permute.xlu1 %697 }
 0x581   :  { %3017 = vmatprep.mubr.msk.f32.mxu1 %vm120_vm0, %v698_v36  ;;  %v711_v57 = vsel %vm120_vm0, %v698_v36, %v706_v35 }
 0x582   :  { %3006 = vmatprep.mubr.msk.f32.mxu0 %vm423_vm3, %v711_v57 }
 0x584   :  { %v700_v38 = vpop.permute.xlu1 %699 }
 0x585   :  { %v712_v40 = vsel %vm120_vm0, %v700_v38, %v708_v37  ;;  %3018 = vmatmul.mubr.msk.f32.vlgmr.msra.gmra.mxu1 %vm120_vm0, %v700_v38 }
 0x586   :  { %3007 = vmatmul.mubr.msk.f32.vlgmr.msra.gmra.mxu0 %vm423_vm3, %v712_v40  ;;  %3040 = vmatpush3.msra.mxu1 %v3554_v2 }
 0x587   :  { %3021 = vmatpush3.msra.mxu0 %v3628_v43  ;;  %3041 = vmatprep.subr.mxu1 %v3559_v3 }
 0x588   :  { %3022 = vmatprep.subr.mxu0 %v3633_v44  ;;  %3042 = vmatpush3.msra.mxu1 %v3559_v3 }
 0x589   :  { %3023 = vmatpush3.msra.mxu0 %v3633_v44  ;;  %3043 = vmatprep.subr.mxu1 %v3568_v5 }
 0x58a   :  { %3024 = vmatprep.subr.mxu0 %v3641_v45  ;;  %3044 = vmatpush3.msra.mxu1 %v3568_v5 }
 0x58b   :  { %3025 = vmatpush3.msra.mxu0 %v3641_v45  ;;  %3045 = vmatprep.subr.mxu1 %v3574_v6 }
 0x58c   :  { %3026 = vmatprep.subr.mxu0 %v3650_v47  ;;  %3046 = vmatpush3.msra.mxu1 %v3574_v6 }
 0x58d   :  { %3027 = vmatpush3.msra.mxu0 %v3650_v47  ;;  %3050 = vmatprep.subr.mxu1 %v3628_v43 }
 0x58e   :  { %3028 = vmatprep.subr.mxu0 %v3659_v48 }
 0x58f   :  { %3029 = vmatpush3.msra.mxu0 %v3659_v48 }
 0x590   :  { %3030 = vmatprep.subr.mxu0 %v3668_v50 }
 0x591   :  { %3031 = vmatpush3.msra.mxu0 %v3668_v50 }
 0x592   :  { %3032 = vmatprep.subr.mxu0 %v3684_v51 }
 0x593   :  { %3033 = vmatpush3.msra.mxu0 %v3684_v51 }
 0x594   :  { %3034 = vmatprep.subr.mxu0 %v3692_v52 }
 0x595   :  { %3035 = vmatpush3.msra.mxu0 %v3692_v52 }
 0x596   :  { %3069 = vmatprep.subr.mxu0 %v3554_v2 }
 0x645   :  { %v3019_v13 = vpop.f32.mrf.mxu1 }
 0x646   :  { %v3008_v14 = vpop.f32.mrf.mxu0  ;;  %v931_v21 = vadd.f32 %v3019_v13, %v199_v19 }
 0x647   :  { %v921_v17 = vpop.f32.mrf.mxu1  ;;  %v791_v22 = vadd.f32 %v3008_v14, %v3746_v4 }
 0x648   :  { %v785_v42 = vpop.f32.mrf.mxu0  ;;  %v930_v18 = vadd.f32 %v921_v17, %v196_v39  ;;  %v2737_v29 = vmul.f32 -1.442695, %v931_v21 }
 0x649   :  { %v786_v20 = vadd.f32 %v3746_v4, %v785_v42  ;;  %v2733_v30 = vmul.f32 -1.442695, %v791_v22 }
 0x64a   :  { %3264 = vtanh.f32 %v930_v18  ;;  %v2736_v26 = vmul.f32 -1.442695, %v930_v18 }
 0x64b   :  { %3266 = vtanh.f32 %v786_v20  ;;  %v2732_v27 = vmul.f32 -1.442695, %v786_v20 }
 0x64c   :  { %3268 = vtanh.f32 %v931_v21 }
 0x64d   :  { %3270 = vtanh.f32 %v791_v22 }
 0x64e   :  { %3272 = vpow2.f32 %v2736_v26 }
 0x64f   :  { %3274 = vpow2.f32 %v2732_v27 }
 0x650   :  { %3276 = vpow2.f32 %v2737_v29 }
 0x651   :  { %3278 = vpow2.f32 %v2733_v30  ;;  %v3923_v30 = vsel %vm558_vm5, %v3783_v15, %v3779_v11 }
 0x657   :  { %v3265_v10 = vpop.eup %3264 }
 0x658   :  { %950 = vrot.lane.b32.xlu0 %v3265_v10, %s3496_s26  ;;  %v3267_v23 = vpop.eup %3266  ;;  %v3908_v10 = vsel %vm557_vm4, %v3774_v9, %v3770_v1 }
 0x659   :  { %812 = vrot.lane.b32.xlu1 %v3267_v23, %s3496_s26  ;;  %v3269_v16 = vpop.eup %3268 }
 0x65a   :  { %v3271_v24 = vpop.eup %3270 }
 0x65b   :  { %v3273_v32 = vpop.eup %3272 }
 0x65c   :  { %952 = vrot.lane.b32.xlu0 %v3269_v16, %s3496_s26  ;;  %v3275_v33 = vpop.eup %3274  ;;  %v938_v35 = vadd.f32 1.0, %v3273_v32  ;;  %v3914_v16 = vsel %vm258_vm1, %v3762_v61, 0.0  ;;  %v3932_v61 = vsel %vm259_vm2, %v3765_v0, 0.0  ;;  %vm2291_vm1 = vcmp.gt.s32.totalorder %v3703_v54, 7 }
 0x65d   :  { %814 = vrot.lane.b32.xlu1 %v3271_v24, %s3496_s26  ;;  %v3277_v36 = vpop.eup %3276  ;;  %v800_v57 = vadd.f32 1.0, %v3275_v33  ;;  %vm2292_vm2 = vcmp.gt.s32.totalorder %v3701_v53, 7  ;;  %v2782_v53 = vld [vmem:[%s4667_s8] ss:$0 sm:$0xff] }
 0x65e   :  { %v3279_v37 = vpop.eup %3278  ;;  %v939_v38 = vadd.f32 1.0, %v3277_v36  ;;  %3280 = vrcp.f32 %v938_v35 }
 0x65f   :  { %v801_v40 = vadd.f32 1.0, %v3279_v37  ;;  %3282 = vrcp.f32 %v800_v57 }
 0x660   :  { %3284 = vrcp.f32 %v939_v38 }
 0x661   :  { %3286 = vrcp.f32 %v801_v40 }
 0x66b   :  { %v3281_v41 = vpop.eup %3280 }
 0x66c   :  { %v3283_v14 = vpop.eup %3282  ;;  %v946_v23 = vmul.f32 %v3281_v41, %v3908_v10 }
 0x66d   :  { %v3285_v42 = vpop.eup %3284  ;;  %v808_v27 = vmul.f32 %v3283_v14, %v3914_v16 }
 0x66e   :  { %v3287_v20 = vpop.eup %3286  ;;  %v947_v9 = vmul.f32 %v3285_v42, %v3923_v30 }
 0x66f   :  { %v809_v35 = vmul.f32 %v3287_v20, %v3932_v61 }
 0x6ca   :  { %v951_v49 = vpop.permute.xlu0 %950 }
 0x6cb   :  { %v956_v13 = vmul.f32 %v3281_v41, %v951_v49  ;;  %v813_v39 = vpop.permute.xlu1 %812 }
 0x6cc   :  { %v818_v17 = vmul.f32 %v3283_v14, %v813_v39 }
 0x6cd   :  { %960 = vrot.lane.b32.xlu0 %v956_v13, %s3497_s29 }
 0x6ce   :  { %v953_v18 = vpop.permute.xlu0 %952  ;;  %822 = vrot.lane.b32.xlu1 %v818_v17, %s3497_s29 }
 0x6cf   :  { %v957_v19 = vmul.f32 %v3285_v42, %v953_v18  ;;  %v815_v21 = vpop.permute.xlu1 %814 }
 0x6d0   :  { %v819_v22 = vmul.f32 %v3287_v20, %v815_v21 }
 0x6d1   :  { %962 = vrot.lane.b32.xlu0 %v957_v19, %s3497_s29 }
 0x6d2   :  { %824 = vrot.lane.b32.xlu1 %v819_v22, %s3497_s29 }
 0x73f   :  { %v961_v24 = vpop.permute.xlu0 %960 }
 0x740   :  { %v3916_v26 = vadd.f32 %v961_v24, %v946_v23  ;;  %v823_v29 = vpop.permute.xlu1 %822  ;;  %v204_v23 = vadd.f32 %v3872_v60, %v3595_v12 }
 0x741   :  { %v3926_v1 = vadd.f32 %v823_v29, %v808_v27  ;;  %v207_v29 = vadd.f32 %v3874_v46, %v3595_v12 }
 0x742   :  { %3288 = vtanh.f32 %v3916_v26 }
 0x743   :  { %v963_v32 = vpop.permute.xlu0 %962  ;;  %3290 = vtanh.f32 %v3926_v1 }
 0x744   :  { %v3935_v33 = vadd.f32 %v963_v32, %v947_v9  ;;  %v825_v11 = vpop.permute.xlu1 %824 }
 0x745   :  { %v3939_v15 = vadd.f32 %v825_v11, %v809_v35 }
 0x746   :  { %3292 = vtanh.f32 %v3935_v33 }
 0x747   :  { %3294 = vtanh.f32 %v3939_v15 }
 0x74f   :  { %v3289_v36 = vpop.eup %3288 }
 0x750   :  { %972 = vrot.lane.b32.xlu0 %v3289_v36, %s3496_s26  ;;  %v3291_v57 = vpop.eup %3290 }
 0x751   :  { %834 = vrot.lane.b32.xlu1 %v3291_v57, %s3496_s26 }
 0x753   :  { %v3293_v0 = vpop.eup %3292 }
 0x754   :  { %974 = vrot.lane.b32.xlu0 %v3293_v0, %s3496_s26  ;;  %v3295_v37 = vpop.eup %3294 }
 0x755   :  { %836 = vrot.lane.b32.xlu1 %v3295_v37, %s3496_s26 }
 0x7c2   :  { %v973_v38 = vpop.permute.xlu0 %972 }
 0x7c3   :  { %v978_v40 = vmul.f32 %v3281_v41, %v973_v38  ;;  %v835_v49 = vpop.permute.xlu1 %834 }
 0x7c4   :  { %v840_v13 = vmul.f32 %v3283_v14, %v835_v49 }
 0x7c5   :  { %v3950_v39 = vsel %vm846_vm6, %v978_v40, %v3830_v31 }
 0x7c6   :  { %v975_v17 = vpop.permute.xlu0 %974  ;;  %986 = vrot.lane.b32.xlu1 %v3950_v39, %s3497_s29  ;;  %v3957_v19 = vsel %vm557_vm4, %v840_v13, %v3816_v25 }
 0x7c7   :  { %v979_v18 = vmul.f32 %v3285_v42, %v975_v17  ;;  %994 = vrot.lane.b32.xlu0 %v3957_v19, %s3496_s26  ;;  %v837_v41 = vpop.permute.xlu1 %836 }
 0x7c8   :  { %v841_v14 = vmul.f32 %v3287_v20, %v837_v41 }
 0x7c9   :  { %v3965_v31 = vsel %vm847_vm7, %v979_v18, %v3838_v34 }
 0x7ca   :  { %988 = vrot.lane.b32.xlu1 %v3965_v31, %s3497_s29  ;;  %v3972_v25 = vsel %vm558_vm5, %v841_v14, %v3822_v28 }
 0x7cb   :  { %996 = vrot.lane.b32.xlu0 %v3972_v25, %s3496_s26 }
 0x838   :  { %v987_v42 = vpop.permute.xlu1 %986 }
 0x839   :  { %3047 = vmatprep.mubr.msk.f32.mxu1 %vm120_vm0, %v987_v42  ;;  %v995_v20 = vpop.permute.xlu0 %994 }
 0x83a   :  { %v1000_v21 = vsel %vm120_vm0, %v987_v42, %v995_v20 }
 0x83b   :  { %3036 = vmatprep.mubr.msk.f32.mxu0 %vm423_vm3, %v1000_v21 }
 0x83c   :  { %v989_v34 = vpop.permute.xlu1 %988 }
 0x83d   :  { %3048 = vmatmul.mubr.msk.f32.vlgmr.msra.gmra.mxu1 %vm120_vm0, %v989_v34  ;;  %v997_v22 = vpop.permute.xlu0 %996 }
 0x83e   :  { %3051 = vmatpush3.msra.mxu1 %v3628_v43  ;;  %v1001_v28 = vsel %vm120_vm0, %v989_v34, %v997_v22 }
 0x83f   :  { %3052 = vmatprep.subr.mxu1 %v3633_v44  ;;  %3037 = vmatmul.mubr.msk.f32.vlgmr.msra.gmra.mxu0 %vm423_vm3, %v1001_v28 }
 0x840   :  { %3053 = vmatpush3.msra.mxu1 %v3633_v44  ;;  %3070 = vmatpush3.msra.mxu0 %v3554_v2 }
 0x841   :  { %3054 = vmatprep.subr.mxu1 %v3641_v45  ;;  %3071 = vmatprep.subr.mxu0 %v3559_v3 }
 0x842   :  { %3055 = vmatpush3.msra.mxu1 %v3641_v45  ;;  %3072 = vmatpush3.msra.mxu0 %v3559_v3 }
 0x843   :  { %3056 = vmatprep.subr.mxu1 %v3650_v47  ;;  %3073 = vmatprep.subr.mxu0 %v3568_v5 }
 0x844   :  { %3057 = vmatpush3.msra.mxu1 %v3650_v47  ;;  %3074 = vmatpush3.msra.mxu0 %v3568_v5 }
 0x845   :  { %3058 = vmatprep.subr.mxu1 %v3659_v48  ;;  %3075 = vmatprep.subr.mxu0 %v3574_v6 }
 0x846   :  { %3059 = vmatpush3.msra.mxu1 %v3659_v48  ;;  %3076 = vmatpush3.msra.mxu0 %v3574_v6 }
 0x847   :  { %3060 = vmatprep.subr.mxu1 %v3668_v50  ;;  %3080 = vmatprep.subr.mxu0 %v3628_v43 }
 0x848   :  { %3061 = vmatpush3.msra.mxu1 %v3668_v50 }
 0x849   :  { %3062 = vmatprep.subr.mxu1 %v3684_v51 }
 0x84a   :  { %3063 = vmatpush3.msra.mxu1 %v3684_v51 }
 0x84b   :  { %3064 = vmatprep.subr.mxu1 %v3692_v52 }
 0x84c   :  { %3065 = vmatpush3.msra.mxu1 %v3692_v52 }
 0x84d   :  { %3099 = vmatprep.subr.mxu1 %v3554_v2 }
 0x8fd   :  { %v3049_v3 = vpop.f32.mrf.mxu1 }
 0x8fe   :  { %v1220_v32 = vadd.f32 %v3049_v3, %v207_v29 }
 0x8ff   :  { %v1210_v5 = vpop.f32.mrf.mxu1  ;;  %v3038_v6 = vpop.f32.mrf.mxu0 }
 0x900   :  { %v1219_v24 = vadd.f32 %v1210_v5, %v204_v23  ;;  %v1080_v35 = vadd.f32 %v3038_v6, %v3746_v4  ;;  %v2745_v57 = vmul.f32 -1.442695, %v1220_v32 }
 0x901   :  { %v1074_v27 = vpop.f32.mrf.mxu0 }
 0x902   :  { %v1075_v9 = vadd.f32 %v3746_v4, %v1074_v27  ;;  %3296 = vtanh.f32 %v1219_v24  ;;  %v2744_v12 = vmul.f32 -1.442695, %v1219_v24  ;;  %v2741_v0 = vmul.f32 -1.442695, %v1080_v35 }
 0x903   :  { %v4024_v27 = vsel %vm846_vm6, %v3916_v26, %v3908_v10  ;;  %v4040_v10 = vsel %vm847_vm7, %v3935_v33, %v3923_v30 }
 0x904   :  { %3298 = vtanh.f32 %v1075_v9  ;;  %v2740_v46 = vmul.f32 -1.442695, %v1075_v9 }
 0x905   :  { %3300 = vtanh.f32 %v1220_v32  ;;  %v4031_v32 = vsel %vm557_vm4, %v3926_v1, %v3914_v16  ;;  %v4050_v16 = vsel %vm558_vm5, %v3939_v15, %v3932_v61 }
 0x906   :  { %3302 = vtanh.f32 %v1080_v35 }
 0x907   :  { %3304 = vpow2.f32 %v2744_v12 }
 0x908   :  { %3306 = vpow2.f32 %v2740_v46 }
 0x909   :  { %3308 = vpow2.f32 %v2745_v57 }
 0x90a   :  { %3310 = vpow2.f32 %v2741_v0 }
 0x90f   :  { %v3297_v2 = vpop.eup %3296 }
 0x910   :  { %1239 = vrot.lane.b32.xlu0 %v3297_v2, %s3496_s26 }
 0x911   :  { %v3299_v11 = vpop.eup %3298 }
 0x912   :  { %1101 = vrot.lane.b32.xlu1 %v3299_v11, %s3496_s26  ;;  %v3301_v60 = vpop.eup %3300 }
 0x913   :  { %v3303_v36 = vpop.eup %3302 }
 0x914   :  { %1241 = vrot.lane.b32.xlu0 %v3301_v60, %s3496_s26  ;;  %v3305_v37 = vpop.eup %3304 }
 0x915   :  { %v3307_v38 = vpop.eup %3306  ;;  %v1227_v40 = vadd.f32 1.0, %v3305_v37 }
 0x916   :  { %1103 = vrot.lane.b32.xlu1 %v3303_v36, %s3496_s26  ;;  %v3309_v49 = vpop.eup %3308  ;;  %v1089_v13 = vadd.f32 1.0, %v3307_v38 }
 0x917   :  { %v3311_v17 = vpop.eup %3310  ;;  %v1228_v18 = vadd.f32 1.0, %v3309_v49  ;;  %3312 = vrcp.f32 %v1227_v40 }
 0x918   :  { %v1090_v41 = vadd.f32 1.0, %v3311_v17  ;;  %3314 = vrcp.f32 %v1089_v13 }
 0x919   :  { %3316 = vrcp.f32 %v1228_v18 }
 0x91a   :  { %3318 = vrcp.f32 %v1090_v41 }
 0x924   :  { %v3313_v14 = vpop.eup %3312 }
 0x925   :  { %v3315_v21 = vpop.eup %3314  ;;  %v1235_v29 = vmul.f32 %v3313_v14, %v4024_v27 }
 0x926   :  { %v3317_v28 = vpop.eup %3316  ;;  %v1097_v2 = vmul.f32 %v3315_v21, %v4031_v32 }
 0x927   :  { %v3319_v23 = vpop.eup %3318  ;;  %v1236_v60 = vmul.f32 %v3317_v28, %v4040_v10 }
 0x928   :  { %v1098_v30 = vmul.f32 %v3319_v23, %v4050_v16 }
 0x982   :  { %v1240_v42 = vpop.permute.xlu0 %1239 }
 0x983   :  { %v1245_v20 = vmul.f32 %v3313_v14, %v1240_v42 }
 0x984   :  { %v1102_v34 = vpop.permute.xlu1 %1101 }
 0x985   :  { %v1107_v22 = vmul.f32 %v3315_v21, %v1102_v34  ;;  %1249 = vrot.lane.b32.xlu0 %v1245_v20, %s3497_s29 }
 0x986   :  { %v1242_v3 = vpop.permute.xlu0 %1241 }
 0x987   :  { %v1246_v5 = vmul.f32 %v3317_v28, %v1242_v3  ;;  %1111 = vrot.lane.b32.xlu1 %v1107_v22, %s3497_s29  ;;  %v4107_v22 = vld [vmem:[%s4660_s3 + $0x18] sm:$0xff] }
 0x988   :  { %v1104_v6 = vpop.permute.xlu1 %1103 }
 0x989   :  { %v1108_v24 = vmul.f32 %v3319_v23, %v1104_v6  ;;  %1251 = vrot.lane.b32.xlu0 %v1246_v5, %s3497_s29 }
 0x98b   :  { %1113 = vrot.lane.b32.xlu1 %v1108_v24, %s3497_s29 }
 0x9f7   :  { %v1250_v9 = vpop.permute.xlu0 %1249 }
 0x9f8   :  { %v4033_v35 = vadd.f32 %v1250_v9, %v1235_v29 }
 0x9f9   :  { %v1112_v11 = vpop.permute.xlu1 %1111 }
 0x9fa   :  { %3320 = vtanh.f32 %v4033_v35  ;;  %v4043_v26 = vadd.f32 %v1112_v11, %v1097_v2 }
 0x9fb   :  { %v1252_v36 = vpop.permute.xlu0 %1251 }
 0x9fc   :  { %3322 = vtanh.f32 %v4043_v26  ;;  %v4053_v1 = vadd.f32 %v1252_v36, %v1236_v60 }
 0x9fd   :  { %v1114_v33 = vpop.permute.xlu1 %1113 }
 0x9fe   :  { %3324 = vtanh.f32 %v4053_v1  ;;  %v4057_v12 = vadd.f32 %v1114_v33, %v1098_v30 }
 0xa00   :  { %3326 = vtanh.f32 %v4057_v12 }
 0xa07   :  { %v3321_v46 = vpop.eup %3320 }
 0xa08   :  { %1261 = vrot.lane.b32.xlu0 %v3321_v46, %s3496_s26 }
 0xa09   :  { %v3323_v57 = vpop.eup %3322 }
 0xa0a   :  { %1123 = vrot.lane.b32.xlu1 %v3323_v57, %s3496_s26 }
 0xa0b   :  { %v3325_v61 = vpop.eup %3324 }
 0xa0c   :  { %1263 = vrot.lane.b32.xlu0 %v3325_v61, %s3496_s26 }
 0xa0d   :  { %v3327_v15 = vpop.eup %3326 }
 0xa0e   :  { %1125 = vrot.lane.b32.xlu1 %v3327_v15, %s3496_s26 }
 0xa7a   :  { %v1262_v0 = vpop.permute.xlu0 %1261 }
 0xa7b   :  { %v1267_v37 = vmul.f32 %v3313_v14, %v1262_v0 }
 0xa7c   :  { %v1124_v38 = vpop.permute.xlu1 %1123 }
 0xa7d   :  { %v1129_v40 = vmul.f32 %v3315_v21, %v1124_v38  ;;  %v4068_v49 = vsel %vm1135_vm8, %v1267_v37, %v3950_v39 }
 0xa7e   :  { %v1264_v13 = vpop.permute.xlu0 %1263  ;;  %1275 = vrot.lane.b32.xlu1 %v4068_v49, %s3497_s29 }
 0xa7f   :  { %v1268_v17 = vmul.f32 %v3317_v28, %v1264_v13  ;;  %v4075_v18 = vsel %vm846_vm6, %v1129_v40, %v3957_v19 }
 0xa80   :  { %1283 = vrot.lane.b32.xlu0 %v4075_v18, %s3496_s26  ;;  %v1126_v41 = vpop.permute.xlu1 %1125 }
 0xa81   :  { %v1130_v14 = vmul.f32 %v3319_v23, %v1126_v41  ;;  %v4083_v39 = vsel %vm1136_vm9, %v1268_v17, %v3965_v31 }
 0xa82   :  { %1277 = vrot.lane.b32.xlu1 %v4083_v39, %s3497_s29 }
 0xa83   :  { %v4090_v19 = vsel %vm847_vm7, %v1130_v14, %v3972_v25 }
 0xa84   :  { %1285 = vrot.lane.b32.xlu0 %v4090_v19, %s3496_s26 }
 0xaf0   :  { %v1276_v42 = vpop.permute.xlu1 %1275 }
 0xaf1   :  { %3077 = vmatprep.mubr.msk.f32.mxu0 %vm120_vm0, %v1276_v42 }
 0xaf2   :  { %v1284_v20 = vpop.permute.xlu0 %1283 }
 0xaf3   :  { %v1289_v21 = vsel %vm120_vm0, %v1276_v42, %v1284_v20 }
 0xaf4   :  { %3066 = vmatprep.mubr.msk.f32.mxu1 %vm423_vm3, %v1289_v21  ;;  %v1278_v31 = vpop.permute.xlu1 %1277 }
 0xaf5   :  { %3078 = vmatmul.mubr.msk.f32.vlgmr.msra.gmra.mxu0 %vm120_vm0, %v1278_v31 }
 0xaf6   :  { %v1286_v34 = vpop.permute.xlu0 %1285  ;;  %3081 = vmatpush3.msra.mxu0 %v3628_v43  ;;  %v4114_v43 = vld [vmem:[%s4660_s3 + $0x10] sm:$0xff] }
 0xaf7   :  { %v1290_v25 = vsel %vm120_vm0, %v1278_v31, %v1286_v34  ;;  %3082 = vmatprep.subr.mxu0 %v3633_v44 }
 0xaf8   :  { %3067 = vmatmul.mubr.msk.f32.vlgmr.msra.gmra.mxu1 %vm423_vm3, %v1290_v25  ;;  %3083 = vmatpush3.msra.mxu0 %v3633_v44  ;;  %v4123_v44 = vld [vmem:[%s4660_s3 + $0x8] sm:$0xff] }
 0xaf9   :  { %3084 = vmatprep.subr.mxu0 %v3641_v45  ;;  %3100 = vmatpush3.msra.mxu1 %v4107_v22 }
 0xafa   :  { %3085 = vmatpush3.msra.mxu0 %v3641_v45  ;;  %3101 = vmatprep.subr.mxu1 %v4114_v43  ;;  %v4132_v45 = vld [vmem:[%s4660_s3] sm:$0xff] }
 0xafb   :  { %3086 = vmatprep.subr.mxu0 %v3650_v47  ;;  %3102 = vmatpush3.msra.mxu1 %v4114_v43 }
 0xafc   :  { %3087 = vmatpush3.msra.mxu0 %v3650_v47  ;;  %3103 = vmatprep.subr.mxu1 %v4123_v44  ;;  %v4141_v47 = vld [vmem:[%s4664_s5 + $0x38] sm:$0xff] }
 0xafd   :  { %3088 = vmatprep.subr.mxu0 %v3659_v48  ;;  %3104 = vmatpush3.msra.mxu1 %v4123_v44 }
 0xafe   :  { %3089 = vmatpush3.msra.mxu0 %v3659_v48  ;;  %3105 = vmatprep.subr.mxu1 %v4132_v45 }
 0xaff   :  { %3090 = vmatprep.subr.mxu0 %v3668_v50  ;;  %3106 = vmatpush3.msra.mxu1 %v4132_v45 }
 0xb00   :  { %3091 = vmatpush3.msra.mxu0 %v3668_v50  ;;  %3110 = vmatprep.subr.mxu1 %v4141_v47  ;;  %v4152_v50 = vld [vmem:[%s4662_s4] ss:$0 sm:$0xff] }
 0xb01   :  { %3092 = vmatprep.subr.mxu0 %v3684_v51  ;;  %v212_v28 = vadd.f32 %v4152_v50, %v3878_v56 }
 0xb02   :  { %3093 = vmatpush3.msra.mxu0 %v3684_v51  ;;  %v215_v51 = vadd.f32 %v4152_v50, %v3882_v59 }
 0xb03   :  { %3094 = vmatprep.subr.mxu0 %v3692_v52 }
 0xb04   :  { %3095 = vmatpush3.msra.mxu0 %v3692_v52 }
 0xb05   :  { %3129 = vmatprep.subr.mxu0 %v4107_v22 }
 0xbb5   :  { %v3079_v48 = vpop.f32.mrf.mxu0 }
 0xbb6   :  { %v1509_v24 = vadd.f32 %v3079_v48, %v215_v51  ;;  %v4172_v48 = vsel %vm1135_vm8, %v4033_v35, %v4024_v27  ;;  %v4188_v51 = vsel %vm846_vm6, %v4043_v26, %v4031_v32 }
 0xbb7   :  { %v1499_v3 = vpop.f32.mrf.mxu0 }
 0xbb8   :  { %v1508_v5 = vadd.f32 %v1499_v3, %v212_v28  ;;  %v3068_v23 = vpop.f32.mrf.mxu1  ;;  %v2753_v60 = vmul.f32 -1.442695, %v1509_v24 }
 0xbb9   :  { %v1369_v29 = vadd.f32 %v3068_v23, %v3746_v4  ;;  %v4181_v23 = vsel %vm1136_vm9, %v4053_v1, %v4040_v10  ;;  %v4201_v10 = vsel %vm847_vm7, %v4057_v12, %v4050_v16 }
 0xbba   :  { %v1363_v6 = vpop.f32.mrf.mxu1  ;;  %3328 = vtanh.f32 %v1508_v5  ;;  %v2752_v11 = vmul.f32 -1.442695, %v1508_v5 }
 0xbbb   :  { %v1364_v52 = vadd.f32 %v3746_v4, %v1363_v6  ;;  %3330 = vtanh.f32 %v1509_v24  ;;  %v2749_v4 = vmul.f32 -1.442695, %v1369_v29 }
 0xbbd   :  { %3332 = vtanh.f32 %v1364_v52  ;;  %v2748_v36 = vmul.f32 -1.442695, %v1364_v52 }
 0xbbe   :  { %3334 = vtanh.f32 %v1369_v29 }
 0xbbf   :  { %3336 = vpow2.f32 %v2752_v11 }
 0xbc0   :  { %3338 = vpow2.f32 %v2753_v60 }
 0xbc1   :  { %3340 = vpow2.f32 %v2748_v36 }
 0xbc2   :  { %3342 = vpow2.f32 %v2749_v4 }
 0xbc7   :  { %v3329_v9 = vpop.eup %3328 }
 0xbc8   :  { %1528 = vrot.lane.b32.xlu0 %v3329_v9, %s3496_s26  ;;  %v3331_v56 = vpop.eup %3330 }
 0xbca   :  { %v3333_v2 = vpop.eup %3332 }
 0xbcb   :  { %1390 = vrot.lane.b32.xlu1 %v3333_v2, %s3496_s26  ;;  %v3335_v59 = vpop.eup %3334 }
 0xbcc   :  { %1530 = vrot.lane.b32.xlu0 %v3331_v56, %s3496_s26  ;;  %v3337_v30 = vpop.eup %3336 }
 0xbcd   :  { %v1516_v33 = vadd.f32 1.0, %v3337_v30  ;;  %v3339_v46 = vpop.eup %3338 }
 0xbce   :  { %v3341_v57 = vpop.eup %3340  ;;  %v1517_v61 = vadd.f32 1.0, %v3339_v46 }
 0xbcf   :  { %1392 = vrot.lane.b32.xlu1 %v3335_v59, %s3496_s26  ;;  %3344 = vrcp.f32 %v1516_v33  ;;  %v1378_v15 = vadd.f32 1.0, %v3341_v57  ;;  %v3343_v0 = vpop.eup %3342 }
 0xbd0   :  { %3346 = vrcp.f32 %v1517_v61  ;;  %v1379_v37 = vadd.f32 1.0, %v3343_v0 }
 0xbd1   :  { %3348 = vrcp.f32 %v1378_v15 }
 0xbd2   :  { %3350 = vrcp.f32 %v1379_v37 }
 0xbdc   :  { %v3345_v38 = vpop.eup %3344 }
 0xbdd   :  { %v3347_v17 = vpop.eup %3346  ;;  %v1524_v28 = vmul.f32 %v3345_v38, %v4172_v48 }
 0xbde   :  { %v3349_v14 = vpop.eup %3348  ;;  %v1525_v27 = vmul.f32 %v3347_v17, %v4181_v23 }
 0xbdf   :  { %v3351_v31 = vpop.eup %3350  ;;  %v1386_v35 = vmul.f32 %v3349_v14, %v4188_v51 }
 0xbe0   :  { %v1387_v32 = vmul.f32 %v3351_v31, %v4201_v10 }
 0xc3a   :  { %v1529_v40 = vpop.permute.xlu0 %1528 }
 0xc3b   :  { %v1534_v13 = vmul.f32 %v3345_v38, %v1529_v40 }
 0xc3d   :  { %1538 = vrot.lane.b32.xlu0 %v1534_v13, %s3497_s29  ;;  %v1391_v42 = vpop.permute.xlu1 %1390  ;;  %v4266_v13 = vld [vmem:[%s4664_s5 + $0x20] sm:$0xff] }
 0xc3e   :  { %v1531_v41 = vpop.permute.xlu0 %1530  ;;  %v1396_v21 = vmul.f32 %v3349_v14, %v1391_v42  ;;  %v4301_v42 = vld [vmem:[%s4664_s5] sm:$0xff] }
 0xc3f   :  { %v1535_v20 = vmul.f32 %v3347_v17, %v1531_v41  ;;  %v4284_v41 = vld [vmem:[%s4664_s5 + $0x10] sm:$0xff] }
 0xc40   :  { %1400 = vrot.lane.b32.xlu1 %v1396_v21, %s3497_s29  ;;  %v220_v21 = vadd.f32 %v4152_v50, %v3876_v55 }
 0xc41   :  { %1540 = vrot.lane.b32.xlu0 %v1535_v20, %s3497_s29  ;;  %v1393_v34 = vpop.permute.xlu1 %1392 }
 0xc42   :  { %v1397_v25 = vmul.f32 %v3351_v31, %v1393_v34 }
 0xc44   :  { %1402 = vrot.lane.b32.xlu1 %v1397_v25, %s3497_s29  ;;  %v223_v25 = vadd.f32 %v4152_v50, %v3880_v58 }
 0xcaf   :  { %v1539_v3 = vpop.permute.xlu0 %1538 }
 0xcb0   :  { %v4175_v5 = vadd.f32 %v1539_v3, %v1524_v28 }
 0xcb2   :  { %3352 = vtanh.f32 %v4175_v5  ;;  %v1401_v24 = vpop.permute.xlu1 %1400 }
 0xcb3   :  { %v1541_v6 = vpop.permute.xlu0 %1540  ;;  %v4194_v29 = vadd.f32 %v1401_v24, %v1386_v35  ;;  %v4314_v35 = vld [vmem:[%s4665_s6] ss:$0 sm:$0xff] }
 0xcb4   :  { %v4192_v52 = vadd.f32 %v1541_v6, %v1525_v27 }
 0xcb6   :  { %3354 = vtanh.f32 %v4192_v52  ;;  %v1403_v26 = vpop.permute.xlu1 %1402 }
 0xcb7   :  { %3356 = vtanh.f32 %v4194_v29  ;;  %v4205_v1 = vadd.f32 %v1403_v26, %v1387_v32 }
 0xcb9   :  { %3358 = vtanh.f32 %v4205_v1 }
 0xcbf   :  { %v3353_v9 = vpop.eup %3352 }
 0xcc0   :  { %1550 = vrot.lane.b32.xlu0 %v3353_v9, %s3496_s26 }
 0xcc3   :  { %v3355_v56 = vpop.eup %3354 }
 0xcc4   :  { %v3357_v2 = vpop.eup %3356  ;;  %1552 = vrot.lane.b32.xlu0 %v3355_v56, %s3496_s26 }
 0xcc5   :  { %1412 = vrot.lane.b32.xlu1 %v3357_v2, %s3496_s26 }
 0xcc6   :  { %v3359_v16 = vpop.eup %3358 }
 0xcc9   :  { %1414 = vrot.lane.b32.xlu1 %v3359_v16, %s3496_s26 }
 0xd32   :  { %v1551_v12 = vpop.permute.xlu0 %1550 }
 0xd33   :  { %v1556_v59 = vmul.f32 %v3345_v38, %v1551_v12  ;;  %v4257_v38 = vld [vmem:[%s4664_s5 + $0x28] sm:$0xff] }
 0xd35   :  { %v4216_v11 = vsel %vm1424_vm10, %v1556_v59, %v4068_v49 }
 0xd36   :  { %v1553_v60 = vpop.permute.xlu0 %1552  ;;  %1564 = vrot.lane.b32.xlu1 %v4216_v11, %s3497_s29 }
 0xd37   :  { %v1413_v36 = vpop.permute.xlu1 %1412  ;;  %v1557_v4 = vmul.f32 %v3347_v17, %v1553_v60  ;;  %v4275_v17 = vld [vmem:[%s4664_s5 + $0x18] sm:$0xff] }
 0xd38   :  { %v1418_v30 = vmul.f32 %v3349_v14, %v1413_v36  ;;  %v4293_v14 = vld [vmem:[%s4664_s5 + $0x8] sm:$0xff] }
 0xd39   :  { %v4224_v33 = vsel %vm1425_vm11, %v1557_v4, %v4083_v39 }
 0xd3a   :  { %v4229_v46 = vsel %vm1135_vm8, %v1418_v30, %v4075_v18  ;;  %1566 = vrot.lane.b32.xlu1 %v4224_v33, %s3497_s29 }
 0xd3b   :  { %1572 = vrot.lane.b32.xlu0 %v4229_v46, %s3496_s26  ;;  %v1415_v49 = vpop.permute.xlu1 %1414 }
 0xd3c   :  { %v1419_v57 = vmul.f32 %v3351_v31, %v1415_v49 }
 0xd3e   :  { %v4238_v61 = vsel %vm1136_vm9, %v1419_v57, %v4090_v19  ;;  %v4250_v19 = vld [vmem:[%s4664_s5 + $0x30] sm:$0xff] }
 0xd3f   :  { %1574 = vrot.lane.b32.xlu0 %v4238_v61, %s3496_s26 }
 0xda8   :  { %v1565_v39 = vpop.permute.xlu1 %1564 }
 0xda9   :  { %3107 = vmatprep.mubr.msk.f32.mxu1 %vm120_vm0, %v1565_v39 }
 0xdac   :  { %v1567_v18 = vpop.permute.xlu1 %1566 }
 0xdad   :  { %v1573_v15 = vpop.permute.xlu0 %1572  ;;  %3108 = vmatmul.mubr.msk.f32.vlgmr.msra.gmra.mxu1 %vm120_vm0, %v1567_v18 }
 0xdae   :  { %v1578_v0 = vsel %vm120_vm0, %v1565_v39, %v1573_v15  ;;  %3111 = vmatpush3.msra.mxu1 %v4141_v47 }
 0xdaf   :  { %3096 = vmatprep.mubr.msk.f32.mxu0 %vm423_vm3, %v1578_v0  ;;  %3112 = vmatprep.subr.mxu1 %v4250_v19 }
 0xdb0   :  { %3113 = vmatpush3.msra.mxu1 %v4250_v19 }
 0xdb1   :  { %v1575_v37 = vpop.permute.xlu0 %1574  ;;  %3114 = vmatprep.subr.mxu1 %v4257_v38 }
 0xdb2   :  { %v1579_v40 = vsel %vm120_vm0, %v1567_v18, %v1575_v37  ;;  %3115 = vmatpush3.msra.mxu1 %v4257_v38 }
 0xdb3   :  { %3097 = vmatmul.mubr.msk.f32.vlgmr.msra.gmra.mxu0 %vm423_vm3, %v1579_v40  ;;  %3116 = vmatprep.subr.mxu1 %v4266_v13 }
 0xdb4   :  { %3130 = vmatpush3.msra.mxu0 %v4107_v22  ;;  %3117 = vmatpush3.msra.mxu1 %v4266_v13 }
 0xdb5   :  { %3131 = vmatprep.subr.mxu0 %v4114_v43  ;;  %3118 = vmatprep.subr.mxu1 %v4275_v17 }
 0xdb6   :  { %3132 = vmatpush3.msra.mxu0 %v4114_v43  ;;  %3119 = vmatpush3.msra.mxu1 %v4275_v17 }
 0xdb7   :  { %3133 = vmatprep.subr.mxu0 %v4123_v44  ;;  %3120 = vmatprep.subr.mxu1 %v4284_v41 }
 0xdb8   :  { %3134 = vmatpush3.msra.mxu0 %v4123_v44  ;;  %3121 = vmatpush3.msra.mxu1 %v4284_v41 }
 0xdb9   :  { %3135 = vmatprep.subr.mxu0 %v4132_v45  ;;  %3122 = vmatprep.subr.mxu1 %v4293_v14 }
 0xdba   :  { %3136 = vmatpush3.msra.mxu0 %v4132_v45  ;;  %3123 = vmatpush3.msra.mxu1 %v4293_v14 }
 0xdbb   :  { %3124 = vmatprep.subr.mxu1 %v4301_v42  ;;  %3140 = vmatprep.subr.mxu0 %v4141_v47 }
 0xdbc   :  { %3125 = vmatpush3.msra.mxu1 %v4301_v42 }
 0xdbd   :  { %3159 = vmatprep.subr.mxu1 %v4107_v22 }
 0xe6d   :  { %v3109_v20 = vpop.f32.mrf.mxu1 }
 0xe6e   :  { %v1798_v28 = vadd.f32 %v3109_v20, %v223_v25 }
 0xe6f   :  { %v1788_v31 = vpop.f32.mrf.mxu1 }
 0xe70   :  { %v1797_v34 = vadd.f32 %v1788_v31, %v220_v21  ;;  %v2761_v56 = vmul.f32 -1.442695, %v1798_v28 }
 0xe72   :  { %3360 = vtanh.f32 %v1797_v34  ;;  %v2760_v9 = vmul.f32 -1.442695, %v1797_v34 }
 0xe73   :  { %v3098_v3 = vpop.f32.mrf.mxu0  ;;  %3362 = vtanh.f32 %v1798_v28 }
 0xe74   :  { %v1658_v24 = vadd.f32 %v4314_v35, %v3098_v3  ;;  %v4330_v3 = vsel %vm1424_vm10, %v4175_v5, %v4172_v48  ;;  %v4347_v48 = vsel %vm1135_vm8, %v4194_v29, %v4188_v51 }
 0xe75   :  { %v1652_v27 = vpop.f32.mrf.mxu0 }
 0xe76   :  { %v1653_v6 = vadd.f32 %v4314_v35, %v1652_v27  ;;  %v2757_v16 = vmul.f32 -1.442695, %v1658_v24 }
 0xe78   :  { %3364 = vtanh.f32 %v1653_v6  ;;  %v2756_v2 = vmul.f32 -1.442695, %v1653_v6 }
 0xe79   :  { %3366 = vtanh.f32 %v1658_v24 }
 0xe7a   :  { %3368 = vpow2.f32 %v2760_v9 }
 0xe7b   :  { %3370 = vpow2.f32 %v2761_v56 }
 0xe7c   :  { %3372 = vpow2.f32 %v2756_v2 }
 0xe7d   :  { %3374 = vpow2.f32 %v2757_v16 }
 0xe7f   :  { %v3361_v55 = vpop.eup %3360 }
 0xe80   :  { %1817 = vrot.lane.b32.xlu0 %v3361_v55, %s3496_s26  ;;  %v3363_v58 = vpop.eup %3362  ;;  %v4339_v55 = vsel %vm1425_vm11, %v4192_v52, %v4181_v23  ;;  %v4359_v52 = vsel %vm1136_vm9, %v4205_v1, %v4201_v10 }
 0xe84   :  { %1819 = vrot.lane.b32.xlu0 %v3363_v58, %s3496_s26 }
 0xe85   :  { %v3365_v32 = vpop.eup %3364 }
 0xe86   :  { %1679 = vrot.lane.b32.xlu1 %v3365_v32, %s3496_s26  ;;  %v3367_v26 = vpop.eup %3366 }
 0xe87   :  { %v3369_v12 = vpop.eup %3368 }
 0xe88   :  { %v1805_v59 = vadd.f32 1.0, %v3369_v12  ;;  %v3371_v60 = vpop.eup %3370 }
 0xe89   :  { %v3373_v36 = vpop.eup %3372  ;;  %v1806_v4 = vadd.f32 1.0, %v3371_v60 }
 0xe8a   :  { %1681 = vrot.lane.b32.xlu1 %v3367_v26, %s3496_s26  ;;  %3376 = vrcp.f32 %v1805_v59  ;;  %v1667_v30 = vadd.f32 1.0, %v3373_v36  ;;  %v3375_v49 = vpop.eup %3374 }
 0xe8b   :  { %3378 = vrcp.f32 %v1806_v4  ;;  %v1668_v57 = vadd.f32 1.0, %v3375_v49 }
 0xe8c   :  { %3380 = vrcp.f32 %v1667_v30 }
 0xe8d   :  { %3382 = vrcp.f32 %v1668_v57 }
 0xe97   :  { %v3377_v39 = vpop.eup %3376 }
 0xe98   :  { %v3379_v0 = vpop.eup %3378  ;;  %v1813_v27 = vmul.f32 %v3377_v39, %v4330_v3 }
 0xe99   :  { %v3381_v20 = vpop.eup %3380  ;;  %v1814_v58 = vmul.f32 %v3379_v0, %v4339_v55 }
 0xe9a   :  { %v3383_v34 = vpop.eup %3382  ;;  %v1675_v26 = vmul.f32 %v3381_v20, %v4347_v48 }
 0xe9b   :  { %v1676_v51 = vmul.f32 %v3383_v34, %v4359_v52 }
 0xef2   :  { %v1818_v18 = vpop.permute.xlu0 %1817 }
 0xef3   :  { %v1823_v15 = vmul.f32 %v3377_v39, %v1818_v18 }
 0xef5   :  { %1827 = vrot.lane.b32.xlu0 %v1823_v15, %s3497_s29 }
 0xef6   :  { %v1820_v37 = vpop.permute.xlu0 %1819 }
 0xef7   :  { %v1824_v40 = vmul.f32 %v3379_v0, %v1820_v37 }
 0xef8   :  { %v1680_v21 = vpop.permute.xlu1 %1679 }
 0xef9   :  { %v1685_v31 = vmul.f32 %v3381_v20, %v1680_v21  ;;  %1829 = vrot.lane.b32.xlu0 %v1824_v40, %s3497_s29  ;;  %v231_v21 = vadd.f32 %v4152_v50, %v3890_v8 }
 0xefb   :  { %1689 = vrot.lane.b32.xlu1 %v1685_v31, %s3497_s29 }
 0xefc   :  { %v1682_v25 = vpop.permute.xlu1 %1681 }
 0xefd   :  { %v1686_v28 = vmul.f32 %v3383_v34, %v1682_v25 }
 0xeff   :  { %1691 = vrot.lane.b32.xlu1 %v1686_v28, %s3497_s29 }
 0xf67   :  { %v1828_v6 = vpop.permute.xlu0 %1827 }
 0xf68   :  { %v4333_v24 = vadd.f32 %v1828_v6, %v1813_v27 }
 0xf6a   :  { %3384 = vtanh.f32 %v4333_v24 }
 0xf6b   :  { %v1830_v32 = vpop.permute.xlu0 %1829 }
 0xf6c   :  { %v4349_v5 = vadd.f32 %v1830_v32, %v1814_v58 }
 0xf6d   :  { %v1690_v9 = vpop.permute.xlu1 %1689 }
 0xf6e   :  { %3386 = vtanh.f32 %v4349_v5  ;;  %v4353_v23 = vadd.f32 %v1690_v9, %v1675_v26 }
 0xf70   :  { %3388 = vtanh.f32 %v4353_v23 }
 0xf71   :  { %v1692_v29 = vpop.permute.xlu1 %1691 }
 0xf72   :  { %v4363_v56 = vadd.f32 %v1692_v29, %v1676_v51 }
 0xf74   :  { %3390 = vtanh.f32 %v4363_v56 }
 0xf77   :  { %v3385_v2 = vpop.eup %3384 }
 0xf78   :  { %1839 = vrot.lane.b32.xlu0 %v3385_v2, %s3496_s26 }
 0xf7b   :  { %v3387_v16 = vpop.eup %3386 }
 0xf7c   :  { %1841 = vrot.lane.b32.xlu0 %v3387_v16, %s3496_s26 }
 0xf7d   :  { %v3389_v12 = vpop.eup %3388 }
 0xf7e   :  { %1701 = vrot.lane.b32.xlu1 %v3389_v12, %s3496_s26 }
 0xf81   :  { %v3391_v10 = vpop.eup %3390 }
 0xf82   :  { %1703 = vrot.lane.b32.xlu1 %v3391_v10, %s3496_s26 }
 0xfea   :  { %v1840_v1 = vpop.permute.xlu0 %1839 }
 0xfeb   :  { %v1845_v59 = vmul.f32 %v3377_v39, %v1840_v1 }
 0xfed   :  { %v4374_v60 = vsel %vm1713_vm12, %v1845_v59, %v4216_v11 }
 0xfee   :  { %v1842_v36 = vpop.permute.xlu0 %1841  ;;  %1853 = vrot.lane.b32.xlu1 %v4374_v60, %s3497_s29 }
 0xfef   :  { %v1846_v4 = vmul.f32 %v3379_v0, %v1842_v36 }
 0xff0   :  { %v1702_v30 = vpop.permute.xlu1 %1701 }
 0xff1   :  { %v1707_v49 = vmul.f32 %v3381_v20, %v1702_v30  ;;  %v4382_v57 = vsel %vm1714_vm13, %v1846_v4, %v4224_v33 }
 0xff2   :  { %1855 = vrot.lane.b32.xlu1 %v4382_v57, %s3497_s29 }
 0xff3   :  { %v4389_v11 = vsel %vm1424_vm10, %v1707_v49, %v4229_v46 }
 0xff4   :  { %1861 = vrot.lane.b32.xlu0 %v4389_v11, %s3496_s26  ;;  %v1704_v39 = vpop.permute.xlu1 %1703 }
 0xff5   :  { %v1708_v18 = vmul.f32 %v3383_v34, %v1704_v39 }
 0xff7   :  { %v4396_v15 = vsel %vm1425_vm11, %v1708_v18, %v4238_v61 }
 0xff8   :  { %1863 = vrot.lane.b32.xlu0 %v4396_v15, %s3496_s26 }
0x1060   :  { %v1854_v33 = vpop.permute.xlu1 %1853 }
0x1061   :  { %3137 = vmatprep.mubr.msk.f32.mxu0 %vm120_vm0, %v1854_v33 }
0x1064   :  { %v1856_v0 = vpop.permute.xlu1 %1855 }
0x1065   :  { %3138 = vmatmul.mubr.msk.f32.vlgmr.msra.gmra.mxu0 %vm120_vm0, %v1856_v0 }
0x1066   :  { %v1862_v46 = vpop.permute.xlu0 %1861  ;;  %3141 = vmatpush3.msra.mxu0 %v4141_v47 }
0x1067   :  { %v1867_v37 = vsel %vm120_vm0, %v1854_v33, %v1862_v46  ;;  %3142 = vmatprep.subr.mxu0 %v4250_v19 }
0x1068   :  { %3126 = vmatprep.mubr.msk.f32.mxu1 %vm423_vm3, %v1867_v37  ;;  %3143 = vmatpush3.msra.mxu0 %v4250_v19 }
0x1069   :  { %3144 = vmatprep.subr.mxu0 %v4257_v38 }
0x106a   :  { %v1864_v61 = vpop.permute.xlu0 %1863  ;;  %3145 = vmatpush3.msra.mxu0 %v4257_v38 }
0x106b   :  { %v1868_v40 = vsel %vm120_vm0, %v1856_v0, %v1864_v61  ;;  %3146 = vmatprep.subr.mxu0 %v4266_v13 }
0x106c   :  { %3127 = vmatmul.mubr.msk.f32.vlgmr.msra.gmra.mxu1 %vm423_vm3, %v1868_v40  ;;  %3147 = vmatpush3.msra.mxu0 %v4266_v13 }
0x106d   :  { %3160 = vmatpush3.msra.mxu1 %v4107_v22  ;;  %3148 = vmatprep.subr.mxu0 %v4275_v17 }
0x106e   :  { %3161 = vmatprep.subr.mxu1 %v4114_v43  ;;  %3149 = vmatpush3.msra.mxu0 %v4275_v17 }
0x106f   :  { %3162 = vmatpush3.msra.mxu1 %v4114_v43  ;;  %3150 = vmatprep.subr.mxu0 %v4284_v41  ;;  %v228_v43 = vadd.f32 %v4152_v50, %v3886_v63 }
0x1070   :  { %3163 = vmatprep.subr.mxu1 %v4123_v44  ;;  %3151 = vmatpush3.msra.mxu0 %v4284_v41 }
0x1071   :  { %3164 = vmatpush3.msra.mxu1 %v4123_v44  ;;  %3152 = vmatprep.subr.mxu0 %v4293_v14 }
0x1072   :  { %3165 = vmatprep.subr.mxu1 %v4132_v45  ;;  %3153 = vmatpush3.msra.mxu0 %v4293_v14 }
0x1073   :  { %3166 = vmatpush3.msra.mxu1 %v4132_v45  ;;  %3154 = vmatprep.subr.mxu0 %v4301_v42 }
0x1074   :  { %3155 = vmatpush3.msra.mxu0 %v4301_v42  ;;  %3170 = vmatprep.subr.mxu1 %v4141_v47 }
0x1125   :  { %v3139_v22 = vpop.f32.mrf.mxu0 }
0x1126   :  { %v2087_v31 = vadd.f32 %v3139_v22, %v231_v21  ;;  %v4447_v22 = vsel %vm1713_vm12, %v4333_v24, %v4330_v3  ;;  %v4456_v21 = vsel %vm1714_vm13, %v4349_v5, %v4339_v55  ;;  %v4466_v3 = vsel %vm1424_vm10, %v4353_v23, %v4347_v48 }
0x1127   :  { %v2077_v20 = vpop.f32.mrf.mxu0  ;;  %v4476_v5 = vsel %vm1425_vm11, %v4363_v56, %v4359_v52 }
0x1128   :  { %v2086_v44 = vadd.f32 %v2077_v20, %v228_v43  ;;  %v2769_v32 = vmul.f32 -1.442695, %v2087_v31 }
0x112a   :  { %3392 = vtanh.f32 %v2086_v44  ;;  %v2768_v58 = vmul.f32 -1.442695, %v2086_v44 }
0x112b   :  { %3394 = vtanh.f32 %v2087_v31 }
0x112c   :  { %v3128_v34 = vpop.f32.mrf.mxu1 }
0x112d   :  { %v1947_v28 = vadd.f32 %v4314_v35, %v3128_v34 }
0x112e   :  { %v1941_v25 = vpop.f32.mrf.mxu1 }
0x112f   :  { %v1942_v45 = vadd.f32 %v4314_v35, %v1941_v25  ;;  %v2765_v9 = vmul.f32 -1.442695, %v1947_v28 }
0x1131   :  { %3396 = vtanh.f32 %v1942_v45  ;;  %v2764_v26 = vmul.f32 -1.442695, %v1942_v45 }
0x1132   :  { %3398 = vtanh.f32 %v1947_v28 }
0x1133   :  { %3400 = vpow2.f32 %v2768_v58 }
0x1134   :  { %3402 = vpow2.f32 %v2769_v32 }
0x1135   :  { %3404 = vpow2.f32 %v2764_v26 }
0x1136   :  { %3406 = vpow2.f32 %v2765_v9 }
0x1137   :  { %v3393_v27 = vpop.eup %3392 }
0x1138   :  { %2106 = vrot.lane.b32.xlu0 %v3393_v27, %s3496_s26  ;;  %v3395_v63 = vpop.eup %3394 }
0x113c   :  { %2108 = vrot.lane.b32.xlu0 %v3395_v63, %s3496_s26 }
0x113e   :  { %v3397_v6 = vpop.eup %3396 }
0x113f   :  { %1968 = vrot.lane.b32.xlu1 %v3397_v6, %s3496_s26  ;;  %v3399_v8 = vpop.eup %3398 }
0x1140   :  { %v3401_v51 = vpop.eup %3400 }
0x1141   :  { %v2094_v29 = vadd.f32 1.0, %v3401_v51  ;;  %v3403_v2 = vpop.eup %3402 }
0x1142   :  { %v3405_v16 = vpop.eup %3404  ;;  %v2095_v12 = vadd.f32 1.0, %v3403_v2 }
0x1143   :  { %1970 = vrot.lane.b32.xlu1 %v3399_v8, %s3496_s26  ;;  %3408 = vrcp.f32 %v2094_v29  ;;  %v1956_v10 = vadd.f32 1.0, %v3405_v16  ;;  %v3407_v1 = vpop.eup %3406 }
0x1144   :  { %3410 = vrcp.f32 %v2095_v12  ;;  %v1957_v59 = vadd.f32 1.0, %v3407_v1 }
0x1145   :  { %3412 = vrcp.f32 %v1956_v10 }
0x1146   :  { %3414 = vrcp.f32 %v1957_v59 }
0x1150   :  { %v3409_v36 = vpop.eup %3408 }
0x1151   :  { %v3411_v49 = vpop.eup %3410  ;;  %v2102_v43 = vmul.f32 %v3409_v36, %v4447_v22 }
0x1152   :  { %v3413_v33 = vpop.eup %3412  ;;  %v2103_v31 = vmul.f32 %v3411_v49, %v4456_v21 }
0x1153   :  { %v3415_v37 = vpop.eup %3414  ;;  %v1964_v24 = vmul.f32 %v3413_v33, %v4466_v3 }
0x1154   :  { %v1965_v28 = vmul.f32 %v3415_v37, %v4476_v5 }
0x11aa   :  { %v2107_v4 = vpop.permute.xlu0 %2106 }
0x11ab   :  { %v2112_v30 = vmul.f32 %v3409_v36, %v2107_v4 }
0x11ad   :  { %2116 = vrot.lane.b32.xlu0 %v2112_v30, %s3497_s29 }
0x11ae   :  { %v2109_v39 = vpop.permute.xlu0 %2108 }
0x11af   :  { %v2113_v18 = vmul.f32 %v3411_v49, %v2109_v39 }
0x11b1   :  { %v1969_v0 = vpop.permute.xlu1 %1968  ;;  %2118 = vrot.lane.b32.xlu0 %v2113_v18, %s3497_s29 }
0x11b2   :  { %v1974_v46 = vmul.f32 %v3413_v33, %v1969_v0 }
0x11b4   :  { %1978 = vrot.lane.b32.xlu1 %v1974_v46, %s3497_s29 }
0x11b5   :  { %v1971_v61 = vpop.permute.xlu1 %1970 }
0x11b6   :  { %v1975_v40 = vmul.f32 %v3415_v37, %v1971_v61 }
0x11b8   :  { %1980 = vrot.lane.b32.xlu1 %v1975_v40, %s3497_s29 }
0x121f   :  { %v2117_v20 = vpop.permute.xlu0 %2116 }
0x1220   :  { %v4450_v44 = vadd.f32 %v2117_v20, %v2102_v43 }
0x1222   :  { %3416 = vtanh.f32 %v4450_v44 }
0x1223   :  { %v2119_v34 = vpop.permute.xlu0 %2118 }
0x1224   :  { %v4460_v25 = vadd.f32 %v2119_v34, %v2103_v31 }
0x1226   :  { %3418 = vtanh.f32 %v4460_v25  ;;  %v1979_v45 = vpop.permute.xlu1 %1978 }
0x1227   :  { %v4470_v55 = vadd.f32 %v1979_v45, %v1964_v24 }
0x1229   :  { %3420 = vtanh.f32 %v4470_v55 }
0x122a   :  { %v1981_v27 = vpop.permute.xlu1 %1980 }
0x122b   :  { %v4480_v48 = vadd.f32 %v1981_v27, %v1965_v28 }
0x122d   :  { %3422 = vtanh.f32 %v4480_v48 }
0x122f   :  { %v3417_v23 = vpop.eup %3416 }
0x1230   :  { %2128 = vrot.lane.b32.xlu0 %v3417_v23, %s3496_s26 }
0x1233   :  { %v3419_v63 = vpop.eup %3418 }
0x1234   :  { %2130 = vrot.lane.b32.xlu0 %v3419_v63, %s3496_s26 }
0x1236   :  { %v3421_v6 = vpop.eup %3420 }
0x1237   :  { %1990 = vrot.lane.b32.xlu1 %v3421_v6, %s3496_s26 }
0x123a   :  { %v3423_v52 = vpop.eup %3422 }
0x123b   :  { %1992 = vrot.lane.b32.xlu1 %v3423_v52, %s3496_s26 }
0x12a2   :  { %v2129_v56 = vpop.permute.xlu0 %2128 }
0x12a3   :  { %v2134_v8 = vmul.f32 %v3409_v36, %v2129_v56 }
0x12a5   :  { %v4491_v58 = vsel %vm2002_vm14, %v2134_v8, %v4374_v60 }
0x12a6   :  { %v2131_v32 = vpop.permute.xlu0 %2130  ;;  %2142 = vrot.lane.b32.xlu1 %v4491_v58, %s3497_s29 }
0x12a7   :  { %v2135_v26 = vmul.f32 %v3411_v49, %v2131_v32 }
0x12a9   :  { %v1991_v9 = vpop.permute.xlu1 %1990  ;;  %v4499_v51 = vsel %vm2003_vm15, %v2135_v26, %v4382_v57  ;;  %v2138_v26 = vsel %vm2002_vm14, %v4450_v44, %v4447_v22 }
0x12aa   :  { %v1996_v29 = vmul.f32 %v3413_v33, %v1991_v9  ;;  %2144 = vrot.lane.b32.xlu1 %v4499_v51, %s3497_s29 }
0x12ac   :  { %v4506_v60 = vsel %vm1713_vm12, %v1996_v29, %v4389_v11 }
0x12ad   :  { %2150 = vrot.lane.b32.xlu0 %v4506_v60, %s3496_s26  ;;  %v1993_v2 = vpop.permute.xlu1 %1992 }
0x12ae   :  { %v1997_v16 = vmul.f32 %v3415_v37, %v1993_v2 }
0x12b0   :  { %v4513_v12 = vsel %vm1714_vm13, %v1997_v16, %v4396_v15  ;;  %v2139_v16 = vsel %vm2003_vm15, %v4460_v25, %v4456_v21  ;;  %v4573_v21 = vsel %vm1714_vm13, %v4480_v48, %v4476_v5 }
0x12b1   :  { %2152 = vrot.lane.b32.xlu0 %v4513_v12, %s3496_s26 }
0x1318   :  { %v2143_v57 = vpop.permute.xlu1 %2142 }
0x1319   :  { %3167 = vmatprep.mubr.msk.f32.mxu1 %vm120_vm0, %v2143_v57 }
0x131c   :  { %v2145_v10 = vpop.permute.xlu1 %2144 }
0x131d   :  { %3168 = vmatmul.mubr.msk.f32.vlgmr.msra.gmra.mxu1 %vm120_vm0, %v2145_v10 }
0x131e   :  { %3171 = vmatpush3.msra.mxu1 %v4141_v47 }
0x131f   :  { %v2151_v11 = vpop.permute.xlu0 %2150  ;;  %3172 = vmatprep.subr.mxu1 %v4250_v19 }
0x1320   :  { %v2156_v1 = vsel %vm120_vm0, %v2143_v57, %v2151_v11  ;;  %3173 = vmatpush3.msra.mxu1 %v4250_v19  ;;  %v236_v19 = vadd.f32 %v4152_v50, %v3884_v62 }
0x1321   :  { %3156 = vmatprep.mubr.msk.f32.mxu0 %vm423_vm3, %v2156_v1  ;;  %3174 = vmatprep.subr.mxu1 %v4257_v38  ;;  %v4564_v1 = vsel %vm1713_vm12, %v4470_v55, %v4466_v3 }
0x1322   :  { %3175 = vmatpush3.msra.mxu1 %v4257_v38 }
0x1323   :  { %v2153_v15 = vpop.permute.xlu0 %2152  ;;  %3176 = vmatprep.subr.mxu1 %v4266_v13 }
0x1324   :  { %v2157_v59 = vsel %vm120_vm0, %v2145_v10, %v2153_v15  ;;  %3177 = vmatpush3.msra.mxu1 %v4266_v13 }
0x1325   :  { %3157 = vmatmul.mubr.msk.f32.vlgmr.msra.gmra.mxu0 %vm423_vm3, %v2157_v59  ;;  %3178 = vmatprep.subr.mxu1 %v4275_v17 }
0x1326   :  { %3179 = vmatpush3.msra.mxu1 %v4275_v17  ;;  %v239_v17 = vadd.f32 %v4152_v50, %v3888_v7 }
0x1327   :  { %3180 = vmatprep.subr.mxu1 %v4284_v41 }
0x1328   :  { %3181 = vmatpush3.msra.mxu1 %v4284_v41 }
0x1329   :  { %3182 = vmatprep.subr.mxu1 %v4293_v14 }
0x132a   :  { %3183 = vmatpush3.msra.mxu1 %v4293_v14 }
0x132b   :  { %3184 = vmatprep.subr.mxu1 %v4301_v42 }
0x132c   :  { %3185 = vmatpush3.msra.mxu1 %v4301_v42 }
0x13dd   :  { %v3169_v47 = vpop.f32.mrf.mxu1 }
0x13de   :  { %v2376_v36 = vadd.f32 %v3169_v47, %v239_v17 }
0x13df   :  { %v2366_v38 = vpop.f32.mrf.mxu1 }
0x13e0   :  { %v2375_v13 = vadd.f32 %v2366_v38, %v236_v19  ;;  %v2777_v39 = vmul.f32 -1.442695, %v2376_v36 }
0x13e2   :  { %3424 = vtanh.f32 %v2375_v13  ;;  %v2776_v50 = vmul.f32 -1.442695, %v2375_v13 }
0x13e3   :  { %3426 = vtanh.f32 %v2376_v36 }
0x13e5   :  { %v3158_v41 = vpop.f32.mrf.mxu0 }
0x13e6   :  { %v2236_v30 = vadd.f32 %v4314_v35, %v3158_v41 }
0x13e7   :  { %v2230_v4 = vpop.f32.mrf.mxu0 }
0x13e8   :  { %v2231_v14 = vadd.f32 %v4314_v35, %v2230_v4  ;;  %v2773_v33 = vmul.f32 -1.442695, %v2236_v30 }
0x13ea   :  { %3428 = vtanh.f32 %v2231_v14  ;;  %v2772_v18 = vmul.f32 -1.442695, %v2231_v14 }
0x13eb   :  { %3430 = vtanh.f32 %v2236_v30 }
0x13ec   :  { %3432 = vpow2.f32 %v2776_v50 }
0x13ed   :  { %3434 = vpow2.f32 %v2777_v39 }
0x13ee   :  { %3436 = vpow2.f32 %v2772_v18 }
0x13ef   :  { %v3425_v42 = vpop.eup %3424  ;;  %3438 = vpow2.f32 %v2773_v33 }
0x13f0   :  { %2395 = vrot.lane.b32.xlu0 %v3425_v42, %s3496_s26  ;;  %v3427_v62 = vpop.eup %3426 }
0x13f4   :  { %2397 = vrot.lane.b32.xlu0 %v3427_v62, %s3496_s26 }
0x13f7   :  { %v3429_v49 = vpop.eup %3428 }
0x13f8   :  { %2257 = vrot.lane.b32.xlu1 %v3429_v49, %s3496_s26  ;;  %v3431_v7 = vpop.eup %3430 }
0x13f9   :  { %v3433_v0 = vpop.eup %3432 }
0x13fa   :  { %v2383_v46 = vadd.f32 1.0, %v3433_v0  ;;  %v3435_v37 = vpop.eup %3434 }
0x13fb   :  { %v2384_v61 = vadd.f32 1.0, %v3435_v37  ;;  %v3437_v40 = vpop.eup %3436 }
0x13fc   :  { %2259 = vrot.lane.b32.xlu1 %v3431_v7, %s3496_s26  ;;  %3440 = vrcp.f32 %v2383_v46  ;;  %v2245_v43 = vadd.f32 1.0, %v3437_v40  ;;  %v3439_v20 = vpop.eup %3438 }
0x13fd   :  { %3442 = vrcp.f32 %v2384_v61  ;;  %v2246_v31 = vadd.f32 1.0, %v3439_v20 }
0x13fe   :  { %3444 = vrcp.f32 %v2245_v43 }
0x13ff   :  { %3446 = vrcp.f32 %v2246_v31 }
0x1409   :  { %v3441_v34 = vpop.eup %3440 }
0x140a   :  { %v3443_v28 = vpop.eup %3442  ;;  %v2391_v9 = vmul.f32 %v3441_v34, %v2138_v26 }
0x140b   :  { %v3445_v63 = vpop.eup %3444  ;;  %v2392_v57 = vmul.f32 %v3443_v28, %v2139_v16  ;;  %v2577_v16 = vld [vmem:[%s4666_s7 + $0x8] sm:$0xff] }
0x140c   :  { %v3447_v56 = vpop.eup %3446  ;;  %v2253_v22 = vmul.f32 %v3445_v63, %v4564_v1 }
0x140d   :  { %v2254_v25 = vmul.f32 %v3447_v56, %v4573_v21 }
0x1462   :  { %v2396_v24 = vpop.permute.xlu0 %2395 }
0x1463   :  { %v2401_v45 = vmul.f32 %v3441_v34, %v2396_v24 }
0x1465   :  { %2405 = vrot.lane.b32.xlu0 %v2401_v45, %s3497_s29 }
0x1466   :  { %v2398_v27 = vpop.permute.xlu0 %2397 }
0x1467   :  { %v2402_v23 = vmul.f32 %v3443_v28, %v2398_v27 }
0x1469   :  { %2407 = vrot.lane.b32.xlu0 %v2402_v23, %s3497_s29 }
0x146a   :  { %v2258_v6 = vpop.permute.xlu1 %2257 }
0x146b   :  { %v2263_v52 = vmul.f32 %v3445_v63, %v2258_v6 }
0x146d   :  { %2267 = vrot.lane.b32.xlu1 %v2263_v52, %s3497_s29 }
0x146e   :  { %v2260_v8 = vpop.permute.xlu1 %2259 }
0x146f   :  { %v2264_v32 = vmul.f32 %v3447_v56, %v2260_v8 }
0x1471   :  { %2269 = vrot.lane.b32.xlu1 %v2264_v32, %s3497_s29 }
0x14d7   :  { %v2406_v29 = vpop.permute.xlu0 %2405 }
0x14d8   :  { %v2411_v2 = vadd.f32 %v2406_v29, %v2391_v9  ;;  %v2579_v29 = vld [vmem:[%s4666_s7 + $0x18] sm:$0xff] }
0x14d9   :  { %3189 = vmatprep.subr.mxu0 %v2579_v29 }
0x14da   :  { %3448 = vtanh.f32 %v2411_v2  ;;  %v2578_v2 = vld [vmem:[%s4666_s7 + $0x10] sm:$0xff]  ;;  %3190 = vmatpush3.msra.mxu0 %v2579_v29 }
0x14db   :  { %v2408_v10 = vpop.permute.xlu0 %2407  ;;  %3191 = vmatprep.subr.mxu0 %v2578_v2 }
0x14dc   :  { %v2412_v11 = vadd.f32 %v2408_v10, %v2392_v57  ;;  %3192 = vmatpush3.msra.mxu0 %v2578_v2 }
0x14dd   :  { %3193 = vmatprep.subr.mxu0 %v2577_v16 }
0x14de   :  { %3450 = vtanh.f32 %v2412_v11  ;;  %3194 = vmatpush3.msra.mxu0 %v2577_v16  ;;  %v2576_v11 = vld [vmem:[%s4666_s7] sm:$0xff] }
0x14df   :  { %v2268_v44 = vpop.permute.xlu1 %2267  ;;  %3195 = vmatprep.subr.mxu0 %v2576_v11 }
0x14e0   :  { %v4567_v15 = vadd.f32 %v2268_v44, %v2253_v22  ;;  %3196 = vmatpush3.msra.mxu0 %v2576_v11 }
0x14e2   :  { %3452 = vtanh.f32 %v4567_v15  ;;  %v2289_v8 = vsel %vm2002_vm14, %v4567_v15, %v4564_v1 }
0x14e3   :  { %v2270_v59 = vpop.permute.xlu1 %2269 }
0x14e4   :  { %v4577_v47 = vadd.f32 %v2270_v59, %v2254_v25 }
0x14e6   :  { %3454 = vtanh.f32 %v4577_v47 }
0x14e7   :  { %v3449_v3 = vpop.eup %3448 }
0x14e8   :  { %2417 = vrot.lane.b32.xlu0 %v3449_v3, %s3496_s26 }
0x14eb   :  { %v3451_v55 = vpop.eup %3450 }
0x14ec   :  { %2419 = vrot.lane.b32.xlu0 %v3451_v55, %s3496_s26 }
0x14ef   :  { %v3453_v19 = vpop.eup %3452 }
0x14f0   :  { %2279 = vrot.lane.b32.xlu1 %v3453_v19, %s3496_s26 }
0x14f3   :  { %v3455_v5 = vpop.eup %3454 }
0x14f4   :  { %2281 = vrot.lane.b32.xlu1 %v3455_v5, %s3496_s26 }
0x155a   :  { %v2418_v48 = vpop.permute.xlu0 %2417 }
0x155b   :  { %v2423_v38 = vmul.f32 %v3441_v34, %v2418_v48 }
0x155d   :  { %v2425_v13 = vsel %vm2291_vm1, %v2423_v38, %v4491_v58 }
0x155e   :  { %v2420_v17 = vpop.permute.xlu0 %2419  ;;  %2429 = vrot.lane.b32.xlu1 %v2425_v13, %s3497_s29 }
0x155f   :  { %v2424_v36 = vmul.f32 %v3443_v28, %v2420_v17 }
0x1561   :  { %v2426_v41 = vsel %vm2292_vm2, %v2424_v36, %v4499_v51 }
0x1562   :  { %v2280_v4 = vpop.permute.xlu1 %2279  ;;  %2431 = vrot.lane.b32.xlu1 %v2426_v41, %s3497_s29 }
0x1563   :  { %v2285_v14 = vmul.f32 %v3445_v63, %v2280_v4  ;;  %v2290_v63 = vsel %vm2003_vm15, %v4577_v47, %v4573_v21 }
0x1565   :  { %v4597_v30 = vsel %vm2002_vm14, %v2285_v14, %v4506_v60 }
0x1566   :  { %2437 = vrot.lane.b32.xlu0 %v4597_v30, %s3496_s26  ;;  %v2282_v58 = vpop.permute.xlu1 %2281 }
0x1567   :  { %v2286_v42 = vmul.f32 %v3447_v56, %v2282_v58 }
0x1569   :  { %v4604_v62 = vsel %vm2003_vm15, %v2286_v42, %v4513_v12 }
0x156a   :  { %2439 = vrot.lane.b32.xlu0 %v4604_v62, %s3496_s26 }
0x15d0   :  { %v2430_v51 = vpop.permute.xlu1 %2429 }
0x15d4   :  { %v2432_v60 = vpop.permute.xlu1 %2431 }
0x15d8   :  { %v2438_v49 = vpop.permute.xlu0 %2437 }
0x15d9   :  { %v2443_v7 = vsel %vm120_vm0, %v2430_v51, %v2438_v49 }
0x15da   :  { %3186 = vmatprep.mubr.msk.f32.mxu1 %vm423_vm3, %v2443_v7 }
0x15dc   :  { %v2440_v50 = vpop.permute.xlu0 %2439 }
0x15dd   :  { %v2444_v39 = vsel %vm120_vm0, %v2432_v60, %v2440_v50 }
0x15de   :  { %3187 = vmatmul.mubr.msk.f32.vlgmr.msra.gmra.mxu1 %vm423_vm3, %v2444_v39 }
0x169e   :  { %v3188_v18 = vpop.f32.mrf.mxu1 }
0x169f   :  { %v2523_v33 = vadd.f32 %v4314_v35, %v3188_v18 }
0x16a0   :  { %v2517_v12 = vpop.f32.mrf.mxu1 }
0x16a1   :  { %3456 = vtanh.f32 %v2523_v33  ;;  %v2518_v0 = vadd.f32 %v4314_v35, %v2517_v12  ;;  %v2781_v61 = vmul.f32 -1.442695, %v2523_v33 }
0x16a3   :  { %3458 = vtanh.f32 %v2518_v0  ;;  %v2780_v40 = vmul.f32 -1.442695, %v2518_v0 }
0x16a4   :  { %3460 = vpow2.f32 %v2781_v61 }
0x16a5   :  { %3462 = vpow2.f32 %v2780_v40 }
0x16ae   :  { %v3457_v46 = vpop.eup %3456 }
0x16af   :  { %2546 = vrot.lane.b32.xlu0 %v3457_v46, %s3496_s26 }
0x16b0   :  { %v3459_v37 = vpop.eup %3458 }
0x16b1   :  { %2544 = vrot.lane.b32.xlu1 %v3459_v37, %s3496_s26  ;;  %v3461_v43 = vpop.eup %3460 }
0x16b2   :  { %v3463_v20 = vpop.eup %3462  ;;  %v2533_v31 = vadd.f32 1.0, %v3461_v43 }
0x16b3   :  { %v2532_v34 = vadd.f32 1.0, %v3463_v20 }
0x16b4   :  { %3464 = vrcp.f32 %v2533_v31 }
0x16b5   :  { %3466 = vrcp.f32 %v2532_v34 }
0x16c1   :  { %v3465_v24 = vpop.eup %3464 }
0x16c2   :  { %v3467_v28 = vpop.eup %3466  ;;  %v2541_v6 = vmul.f32 %v3465_v24, %v2290_v63 }
0x16c3   :  { %v2540_v32 = vmul.f32 %v3467_v28, %v2289_v8 }
0x1721   :  { %v2547_v45 = vpop.permute.xlu0 %2546 }
0x1722   :  { %v2551_v35 = vmul.f32 %v3465_v24, %v2547_v45 }
0x1723   :  { %v2545_v27 = vpop.permute.xlu1 %2544 }
0x1724   :  { %2556 = vrot.lane.b32.xlu0 %v2551_v35, %s3497_s29  ;;  %v2550_v23 = vmul.f32 %v3467_v28, %v2545_v27 }
0x1726   :  { %2554 = vrot.lane.b32.xlu1 %v2550_v23, %s3497_s29 }
0x1796   :  { %v2557_v52 = vpop.permute.xlu0 %2556 }
0x1797   :  { %v2561_v56 = vadd.f32 %v2557_v52, %v2541_v6 }
0x1798   :  { %v2555_v26 = vpop.permute.xlu1 %2554 }
0x1799   :  { %3468 = vtanh.f32 %v2561_v56  ;;  %v2560_v9 = vadd.f32 %v2555_v26, %v2540_v32 }
0x179b   :  { %3470 = vtanh.f32 %v2560_v9 }
0x17a6   :  { %v3469_v57 = vpop.eup %3468 }
0x17a7   :  { %2568 = vrot.lane.b32.xlu0 %v3469_v57, %s3496_s26 }
0x17a8   :  { %v3471_v10 = vpop.eup %3470 }
0x17a9   :  { %2566 = vrot.lane.b32.xlu1 %v3471_v10, %s3496_s26 }
0x1819   :  { %v2569_v1 = vpop.permute.xlu0 %2568 }
0x181a   :  { %v2573_v22 = vmul.f32 %v3465_v24, %v2569_v1 }
0x181b   :  { %v2567_v44 = vpop.permute.xlu1 %2566 }
0x181c   :  { %v2575_v15 = vsel %vm2292_vm2, %v2573_v22, %v4604_v62  ;;  %v2572_v21 = vmul.f32 %v3467_v28, %v2567_v44 }
0x181d   :  { %2591 = vrot.lane.b32.xlu0 %v2575_v15, %s3497_s29 }
0x181e   :  { %v2574_v25 = vsel %vm2291_vm1, %v2572_v21, %v4597_v30 }
0x181f   :  { %2589 = vrot.lane.b32.xlu1 %v2574_v25, %s3497_s29 }
0x188f   :  { %v2592_v47 = vpop.permute.xlu0 %2591 }
0x1891   :  { %v2590_v59 = vpop.permute.xlu1 %2589 }
0x1892   :  { %3197 = vmatprep.mubr.msk.f32.mxu0 %vm120_vm0, %v2590_v59 }
0x1893   :  { %3198 = vmatmul.mubr.msk.f32.vlgmr.msra.gmra.mxu0 %vm120_vm0, %v2592_v47 }
0x1953   :  { %v3199_v3 = vpop.f32.mrf.mxu0 }
0x1954   :  { %v2669_v55 = vadd.f32 %v3199_v3, %v2782_v53 }
0x1955   :  { %v2663_v19 = vpop.f32.mrf.mxu0 }
0x1956   :  { %v2664_v5 = vadd.f32 %v2782_v53, %v2663_v19  ;;  %2674 = vmax.xlane.f32.xlu0 %v2669_v55 }
0x1958   :  { %2672 = vmax.xlane.f32.xlu1 %v2664_v5 }
0x19df   :  { %v2675_v54 = vpop.xlane.xlu0 %2674 }
0x19e0   :  { %v2677_v48 = vsub.f32 %v2669_v55, %v2675_v54 }
0x19e1   :  { %v2673_v38 = vpop.xlane.xlu1 %2672 }
0x19e2   :  { %v2680_v13 = vmul.f32 1.442695, %v2677_v48  ;;  %v2676_v17 = vsub.f32 %v2664_v5, %v2673_v38 }
0x19e4   :  { %3472 = vpow2.f32 %v2680_v13  ;;  %v2678_v36 = vmul.f32 1.442695, %v2676_v17 }
0x19e6   :  { %3474 = vpow2.f32 %v2678_v36 }
0x19f1   :  { %v3473_v41 = vpop.eup %3472 }
0x19f2   :  { %2684 = vadd.xlane.f32.xlu1 %v3473_v41 }
0x19f3   :  { %v3475_v4 = vpop.eup %3474 }
0x19f4   :  { %2682 = vadd.xlane.f32.xlu0 %v3475_v4 }
0x1a7b   :  { %v2685_v14 = vpop.xlane.xlu1 %2684 }
0x1a7c   :  { %3476 = vlog2.f32 %v2685_v14 }
0x1a7d   :  { %v2683_v30 = vpop.xlane.xlu0 %2682 }
0x1a7e   :  { %3478 = vlog2.f32 %v2683_v30 }
0x1a89   :  { %v3477_v58 = vpop.eup %3476 }
0x1a8a   :  { %v2689_v42 = vmul.f32 0.6931472, %v3477_v58 }
0x1a8b   :  { %v3479_v62 = vpop.eup %3478 }
0x1a8c   :  { %v2691_v51 = vadd.f32 %v2689_v42, %v2675_v54  ;;  %v2687_v49 = vmul.f32 0.6931472, %v3479_v62 }
0x1a8e   :  { %v2693_v7 = vsub.f32 %v2669_v55, %v2691_v51  ;;  %v2690_v60 = vadd.f32 %v2687_v49, %v2673_v38 }
0x1a90   :  { %2695 = vst [vmem:[%s4668_s9 + $0x8] sm:$0xff] %v2693_v7  ;;  %v2692_v50 = vsub.f32 %v2664_v5, %v2690_v60 }
0x1a92   :  { %2694 = vst [vmem:[%s4668_s9] sm:$0xff] %v2692_v50 }

</bundles_post_ra>
